<compile_context>
chip_gen: v7x
topology: tpu7x:2x2x1
jax: 0.10.0
libtpu: 0.0.40
codegen_flags: <defaults>
</compile_context>

<pallas_src>
import functools
import math

import jax
import jax.numpy as jnp
from jax import lax
from jax.experimental import pallas as pl
from jax.experimental.pallas import tpu as pltpu


def _round_up(x, m):
    return ((x + m - 1) // m) * m


def _rnn_layer_kernel(*refs, nd, tt, unroll):
    """One (batch-block, time-block) grid step of a masked tanh-RNN layer.

    grid = (num_batch_blocks, num_time_blocks)
      axis 0 ("parallel"):  batch blocks are independent (v7x 2-TC knob).
      axis 1 ("arbitrary"): time blocks, sequential; per-direction hidden
                            state carried in h_scr (f32 VMEM) across blocks.

    All `nd` directions are fused into this single body: the independent
    per-direction chains interleave in the VLIW bundle and hide MXU/EUP
    latency on single-TensorCore chips.

    Ref layout (direction-major groups):
      refs[0:nd]        xp_d  (tt, bb, Hp) bf16  hoisted x @ W_ih^T + b
      refs[nd:2nd]      m_d   (tt, bb, 1)  f32   0/1 mask block (per dir)
      refs[2nd:3nd]     h0_d  (bb, Hp)     f32   initial hidden state
      refs[3nd:4nd]     whh_d (Hp, Hp)     bf16  W_hh^T (zero padded)
      refs[4nd:5nd]     out_d (tt, bb, Hp)       per-step hidden states
      refs[5nd]         h_scr (nd, bb, Hp) f32   carried hidden state

    The backward direction's blocks are selected by the index_map
    (time block nT-1-t) and walked back-to-front inside the block, so no
    wrapper-side jnp.flip of inputs or outputs is needed.
    """
    xp = refs[0:nd]
    m = refs[nd:2 * nd]
    h0 = refs[2 * nd:3 * nd]
    whh = refs[3 * nd:4 * nd]
    out = refs[4 * nd:5 * nd]
    h_scr = refs[5 * nd]

    tb = pl.program_id(1)  # time-block counter (restarts per batch block)

    @pl.when(tb == 0)
    def _():
        for d in range(nd):
            h_scr[d] = h0[d][...].astype(jnp.float32)

    def step(i, hs):
        new_hs = []
        for d in range(nd):
            # Forward direction walks the block front-to-back; the backward
            # direction back-to-front (its blocks already arrive in reverse
            # time order via the index_map).
            j = i if d == 0 else tt - 1 - i
            h = hs[d]
            # W_hh^T streamed from VMEM each step (not hoisted) to avoid
            # pinning registers across the unrolled loop at large Hp.
            g = (jnp.dot(h.astype(jnp.bfloat16), whh[d][...],
                         preferred_element_type=jnp.float32)
                 + xp[d][j].astype(jnp.float32))              # (bb, Hp)
            h_new = jnp.tanh(g)
            # Single-select masked update (== blend for binary masks).
            # TODO(synk): fractional masks would need the original blend.
            h = jnp.where(m[d][j] > 0.5, h_new, h)
            out[d][j] = h.astype(out[d].dtype)
            new_hs.append(h)
        return tuple(new_hs)

    hs = lax.fori_loop(0, tt, step, tuple(h_scr[d] for d in range(nd)),
                       unroll=unroll)
    for d in range(nd):
        h_scr[d] = hs[d]


def _run_layer(xps, mask3, h0s, whhs, *, nd, tt, bb, out_dtype):
    """Run all directions of one layer over the padded sequence.

    xps   : nd x (Tp, Bp, Hp) bf16    mask3 : (Tp, Bp, 1) f32 (shared)
    h0s   : nd x (Bp, Hp)     f32     whhs  : nd x (Hp, Hp) bf16
    Returns nd arrays (Tp, Bp, Hp) in out_dtype, already in NATURAL time
    order for both directions (the reversal lives in the index_maps).
    """
    Tp, Bp, Hp = xps[0].shape
    nT = Tp // tt
    nB = Bp // bb
    # Partial unroll keeps LLO scheduling visibility without exploding
    # code size; fall back to full unroll for small / ragged blocks.
    unroll = 8 if (tt % 8 == 0 and tt > 8) else True

    def dir_map(d):
        if d == 0:
            return lambda b, t: (t, b, 0)
        return lambda b, t: (nT - 1 - t, b, 0)        # reverse direction

    in_specs = (
        [pl.BlockSpec((tt, bb, Hp), dir_map(d)) for d in range(nd)]
        + [pl.BlockSpec((tt, bb, 1), dir_map(d)) for d in range(nd)]
        + [pl.BlockSpec((bb, Hp), lambda b, t: (b, 0)) for _ in range(nd)]
        + [pl.BlockSpec((Hp, Hp), lambda b, t: (0, 0)) for _ in range(nd)]
    )
    out_specs = tuple(pl.BlockSpec((tt, bb, Hp), dir_map(d))
                      for d in range(nd))
    out_shape = tuple(jax.ShapeDtypeStruct((Tp, Bp, Hp), out_dtype)
                      for _ in range(nd))

    outs = pl.pallas_call(
        functools.partial(_rnn_layer_kernel, nd=nd, tt=tt, unroll=unroll),
        out_shape=out_shape,
        grid_spec=pltpu.PrefetchScalarGridSpec(
            num_scalar_prefetch=0,
            grid=(nB, nT),
            in_specs=in_specs,
            out_specs=out_specs,
            scratch_shapes=[pltpu.VMEM((nd, bb, Hp), jnp.float32)],
        ),
        compiler_params=pltpu.CompilerParams(
            dimension_semantics=("parallel", "arbitrary"),
            vmem_limit_bytes=48 * 1024 * 1024),
    )(*(list(xps) + [mask3] * nd + list(h0s) + list(whhs)))
    if not isinstance(outs, (tuple, list)):
        outs = (outs,)
    return outs


class VarMaskedRNN:
    """JAX/Pallas port of VarMaskedRNNBase with a tanh RNN cell (lstm=False)."""

    def __init__(self, input_size, hidden_size, num_layers=1, bias=True,
                 batch_first=False, bidirectional=False, key=None):
        self.input_size = input_size
        self.hidden_size = hidden_size
        self.num_layers = num_layers
        self.bias = bias
        self.batch_first = batch_first
        self.bidirectional = bidirectional
        num_directions = 2 if bidirectional else 1
        self.num_directions = num_directions

        if key is None:
            key = jax.random.PRNGKey(0)
        stdv = 1.0 / math.sqrt(hidden_size)
        self.params = []
        for layer in range(num_layers):
            for _direction in range(num_directions):
                layer_input_size = (input_size if layer == 0
                                    else hidden_size * num_directions)
                key, k1, k2, k3, k4 = jax.random.split(key, 5)
                w_ih = jax.random.uniform(k1, (hidden_size, layer_input_size),
                                          jnp.float32, -stdv, stdv)
                w_hh = jax.random.uniform(k2, (hidden_size, hidden_size),
                                          jnp.float32, -stdv, stdv)
                if bias:
                    b_ih = jax.random.uniform(k3, (hidden_size,),
                                              jnp.float32, -stdv, stdv)
                    b_hh = jax.random.uniform(k4, (hidden_size,),
                                              jnp.float32, -stdv, stdv)
                else:
                    b_ih = jnp.zeros((hidden_size,), jnp.float32)
                    b_hh = jnp.zeros((hidden_size,), jnp.float32)
                # tanh(x W_ih^T + b_ih + h W_hh^T + b_hh): fold the biases.
                self.params.append((w_ih, w_hh, b_ih + b_hh))

    def _xproj(self, layer_in, w_ih, b):
        # Hoisted input projection: one large bf16 MXU matmul over the whole
        # sequence instead of T tiny per-step matmuls inside the kernel.
        xp = jnp.einsum("tbd,hd->tbh",
                        layer_in.astype(jnp.bfloat16),
                        w_ih.astype(jnp.bfloat16),
                        preferred_element_type=jnp.float32) + b
        return xp.astype(jnp.bfloat16)

    def forward(self, x, mask=None, hx=None, *, time_block=64,
                batch_block=None):
        if self.batch_first:
            x = jnp.transpose(x, (1, 0, 2))
            if mask is not None:
                mask = jnp.transpose(mask, (1, 0))
        T, B, _ = x.shape
        nd = self.num_directions
        H = self.hidden_size
        Hp = _round_up(H, 128)            # lane-dense hidden/output width
        Bp = _round_up(B, 8)              # sublane-dense batch
        tt = max(1, min(time_block, T))   # time steps per grid iteration
        Tp = _round_up(T, tt)
        if batch_block is None:
            bb = Bp                       # on v7x pass Bp//2 (mult of 16)
        else:
            bb = _round_up(min(batch_block, Bp), 8)
            Bp = _round_up(Bp, bb)

        if hx is None:
            hx = jnp.zeros((self.num_layers * nd, B, H), x.dtype)
        if mask is None:
            m2 = jnp.ones((T, B), jnp.float32)
        else:
            m2 = mask.reshape(T, B).astype(jnp.float32)
        # One shared padded mask for all layers/directions; padding = 0 so the
        # state passes through padded time steps / batch rows untouched.
        mask3 = jnp.pad(m2, ((0, Tp - T), (0, Bp - B)))[:, :, None]

        next_hidden = []
        layer_in = x
        for layer in range(self.num_layers):
            # bf16 intermediate-layer outputs halve HBM writeback + next-layer
            # read bandwidth; last layer writes the user dtype.
            out_dtype = (jnp.bfloat16 if layer < self.num_layers - 1
                         else x.dtype)
            xps, h0s, whhs = [], [], []
            for direction in range(nd):
                l = layer * nd + direction
                w_ih, w_hh, b = self.params[l]
                xp = self._xproj(layer_in, w_ih, b)        # (T, B, H) bf16
                xps.append(jnp.pad(xp, ((0, Tp - T), (0, Bp - B),
                                        (0, Hp - H))))
                h0s.append(jnp.pad(hx[l].astype(jnp.float32),
                                   ((0, Bp - B), (0, Hp - H))))
                whhs.append(jnp.pad(w_hh.T.astype(jnp.bfloat16),
                                    ((0, Hp - H), (0, Hp - H))))
            outs = _run_layer(xps, mask3, h0s, whhs, nd=nd, tt=tt, bb=bb,
                              out_dtype=out_dtype)
            # Both directions come back in natural time order; un-pad.
            dir_outs = [o[:T, :B, :H] for o in outs]
            # hn = hidden after the last processed real step:
            # forward -> time index T-1, backward -> time index 0.
            next_hidden.append(dir_outs[0][T - 1])
            if nd == 2:
                next_hidden.append(dir_outs[1][0])
            layer_in = (dir_outs[0] if nd == 1
                        else jnp.concatenate(dir_outs, axis=-1))

        output = layer_in
        hn_all = jnp.stack([h.astype(x.dtype) for h in next_hidden], axis=0)
        if self.batch_first:
            output = jnp.transpose(output, (1, 0, 2))
        return output, hn_all

    # Pure-JAX reference (no Pallas) mirroring the kernel's numerics (hoisted
    # bf16 input projection, bf16 recurrent matmul with f32 accumulation,
    # select-based masked update, bf16 intermediate-layer outputs).
    def forward_ref(self, x, mask=None, hx=None):
        if self.batch_first:
            x = jnp.transpose(x, (1, 0, 2))
            if mask is not None:
                mask = jnp.transpose(mask, (1, 0))
        T, B, _ = x.shape
        nd = self.num_directions
        H = self.hidden_size
        if hx is None:
            hx = jnp.zeros((self.num_layers * nd, B, H), x.dtype)
        m3 = (jnp.ones((T, B, 1), jnp.float32) if mask is None
              else mask.reshape(T, B, 1).astype(jnp.float32))
        next_hidden = []
        layer_in = x
        for layer in range(self.num_layers):
            out_dtype = (jnp.bfloat16 if layer < self.num_layers - 1
                         else x.dtype)
            outs = []
            for direction in range(nd):
                l = layer * nd + direction
                w_ih, w_hh, b = self.params[l]
                xp = self._xproj(layer_in, w_ih, b).astype(jnp.float32)
                whh_t = w_hh.T.astype(jnp.bfloat16)
                h = hx[l].astype(jnp.float32)
                steps = range(T - 1, -1, -1) if direction == 1 else range(T)
                out_t = [None] * T
                for t in steps:
                    g = jnp.dot(h.astype(jnp.bfloat16), whh_t,
                                preferred_element_type=jnp.float32) + xp[t]
                    h_new = jnp.tanh(g)
                    h = jnp.where(m3[t] > 0.5, h_new, h)
                    out_t[t] = h.astype(out_dtype)
                next_hidden.append(out_t[T - 1] if direction == 0
                                   else out_t[0])
                outs.append(jnp.stack(out_t, axis=0))
            layer_in = outs[0] if nd == 1 else jnp.concatenate(outs, axis=-1)
        output = layer_in
        hn_all = jnp.stack([h.astype(x.dtype) for h in next_hidden], axis=0)
        if self.batch_first:
            output = jnp.transpose(output, (1, 0, 2))
        return output, hn_all


if __name__ == "__main__":
    key = jax.random.PRNGKey(0)
    k_x, k_p = jax.random.split(key, 2)

    # Small shapes: T=9 with time_block=4 exercises time padding (Tp=12),
    # multi-block hidden-state carry, and the fused reverse-direction path.
    T, B, D_IN, H = 9, 2, 16, 32
    model = VarMaskedRNN(D_IN, H, num_layers=2, bias=True,
                         batch_first=False, bidirectional=True, key=k_p)

    x = jax.random.normal(k_x, (T, B, D_IN), jnp.float32)
    # Binary mask (seq, batch): last two steps of batch element 1 are padding.
    mask = jnp.ones((T, B), jnp.float32).at[T - 2:, 1].set(0.0)

    output, hn = model.forward(x, mask=mask, time_block=4)
    output = jax.block_until_ready(output)
    hn = jax.block_until_ready(hn)

    out_ref, hn_ref = model.forward_ref(x, mask=mask)
    assert output.shape == (T, B, H * 2)
    assert hn.shape == (model.num_layers * 2, B, H)
    # bf16 matmul operands / bf16 intermediate layer outputs make the pipeline
    # sensitive to rare rounding-boundary flips between the padded (kernel)
    # and unpadded (reference) matmuls, so the tolerance is looser than pure
    # f32 (real structural bugs are O(0.1+)).
    err_o = float(jnp.max(jnp.abs(output - out_ref)))
    err_h = float(jnp.max(jnp.abs(hn - hn_ref)))
    assert jnp.allclose(output, out_ref, atol=2e-2, rtol=2e-2), err_o
    assert jnp.allclose(hn, hn_ref, atol=2e-2, rtol=2e-2), err_h

    print("KERNEL_OK")
</pallas_src>

<mosaic_0001>
module attributes {stable_mosaic.version = 11 : i64} {
  func.func @_rnn_layer_kernel(%arg0: i32, %arg1: i32, %arg2: memref<4x8x128xbf16, #tpu.memory_space<vmem>>, %arg3: memref<4x8x128xbf16, #tpu.memory_space<vmem>>, %arg4: memref<4x8x1xf32, #tpu.memory_space<vmem>>, %arg5: memref<4x8x1xf32, #tpu.memory_space<vmem>>, %arg6: memref<8x128xf32, #tpu.memory_space<vmem>>, %arg7: memref<8x128xf32, #tpu.memory_space<vmem>>, %arg8: memref<128x128xbf16, #tpu.memory_space<vmem>>, %arg9: memref<128x128xbf16, #tpu.memory_space<vmem>>, %arg10: memref<4x8x128xbf16, #tpu.memory_space<vmem>>, %arg11: memref<4x8x128xbf16, #tpu.memory_space<vmem>>, %arg12: memref<2x8x128xf32, #tpu.memory_space<vmem>>) attributes {dimension_semantics = [#tpu.dimension_semantics<parallel>, #tpu.dimension_semantics<arbitrary>], iteration_bounds = array<i64: 1, 3>, scalar_prefetch = 0 : i64, scratch_operands = 1 : i64, tpu.core_type = #tpu.core_type<tc>, window_params = [{transform_indices = @transform_0, window_bounds = array<i64: 4, 8, 128>}, {transform_indices = @transform_1, window_bounds = array<i64: 4, 8, 128>}, {transform_indices = @transform_2, window_bounds = array<i64: 4, 8, 1>}, {transform_indices = @transform_3, window_bounds = array<i64: 4, 8, 1>}, {transform_indices = @transform_4, window_bounds = array<i64: 8, 128>}, {transform_indices = @transform_5, window_bounds = array<i64: 8, 128>}, {pipeline_mode = #tpu.pipeline_mode<synchronous>, transform_indices = @transform_6, window_bounds = array<i64: 128, 128>}, {pipeline_mode = #tpu.pipeline_mode<synchronous>, transform_indices = @transform_7, window_bounds = array<i64: 128, 128>}, {transform_indices = @transform_8, window_bounds = array<i64: 4, 8, 128>}, {transform_indices = @transform_9, window_bounds = array<i64: 4, 8, 128>}]} {
    %c0_i32 = arith.constant 0 : i32
    %0 = arith.cmpi eq, %arg1, %c0_i32 : i32
    %1 = arith.extui %0 : i1 to i32
    %c0_i32_0 = arith.constant 0 : i32
    %2 = arith.cmpi ne, %1, %c0_i32_0 : i32
    scf.if %2 {
      %c0_95 = arith.constant 0 : index
      %c0_96 = arith.constant 0 : index
      %193 = vector.load %arg6[%c0_95, %c0_96] : memref<8x128xf32, #tpu.memory_space<vmem>>, vector<8x128xf32>
      %c0_97 = arith.constant 0 : index
      %c0_98 = arith.constant 0 : index
      %c0_99 = arith.constant 0 : index
      %194 = vector.load %arg12[%c0_97, %c0_98, %c0_99] : memref<2x8x128xf32, #tpu.memory_space<vmem>>, vector<1x8x128xf32>
      %195 = vector.shape_cast %194 : vector<1x8x128xf32> to vector<8x128xf32>
      %196 = vector.shape_cast %193 : vector<8x128xf32> to vector<1x8x128xf32>
      tpu.vector_store %arg12[%c0_97, %c0_98, %c0_99], %196 {strides = array<i32>} : memref<2x8x128xf32, #tpu.memory_space<vmem>>, vector<1x8x128xf32>,
      %c0_100 = arith.constant 0 : index
      %c0_101 = arith.constant 0 : index
      %197 = vector.load %arg7[%c0_100, %c0_101] : memref<8x128xf32, #tpu.memory_space<vmem>>, vector<8x128xf32>
      %c1_102 = arith.constant 1 : index
      %c0_103 = arith.constant 0 : index
      %c0_104 = arith.constant 0 : index
      %198 = vector.load %arg12[%c1_102, %c0_103, %c0_104] : memref<2x8x128xf32, #tpu.memory_space<vmem>>, vector<1x8x128xf32>
      %199 = vector.shape_cast %198 : vector<1x8x128xf32> to vector<8x128xf32>
      %200 = vector.shape_cast %197 : vector<8x128xf32> to vector<1x8x128xf32>
      tpu.vector_store %arg12[%c1_102, %c0_103, %c0_104], %200 {strides = array<i32>} : memref<2x8x128xf32, #tpu.memory_space<vmem>>, vector<1x8x128xf32>,
    } else {
    }
    %c0 = arith.constant 0 : index
    %c0_1 = arith.constant 0 : index
    %c0_2 = arith.constant 0 : index
    %3 = vector.load %arg12[%c0, %c0_1, %c0_2] : memref<2x8x128xf32, #tpu.memory_space<vmem>>, vector<1x8x128xf32>
    %4 = vector.shape_cast %3 : vector<1x8x128xf32> to vector<8x128xf32>
    %c1 = arith.constant 1 : index
    %c0_3 = arith.constant 0 : index
    %c0_4 = arith.constant 0 : index
    %5 = vector.load %arg12[%c1, %c0_3, %c0_4] : memref<2x8x128xf32, #tpu.memory_space<vmem>>, vector<1x8x128xf32>
    %6 = vector.shape_cast %5 : vector<1x8x128xf32> to vector<8x128xf32>
    %c0_i32_5 = arith.constant 0 : i32
    %7 = arith.truncf %4 : vector<8x128xf32> to vector<8x128xbf16>
    %c0_6 = arith.constant 0 : index
    %c0_7 = arith.constant 0 : index
    %8 = vector.load %arg8[%c0_6, %c0_7] : memref<128x128xbf16, #tpu.memory_space<vmem>>, vector<128x128xbf16>
    %cst = arith.constant dense<0.000000e+00> : vector<8x128xf32>
    %9 = tpu.matmul %7, %8, %cst {dimension_numbers = #tpu.dot_dimension_numbers<[1], [0], [0], [1], [0, 0, 1, 1], [], []>} : vector<8x128xbf16>, vector<128x128xbf16>, vector<8x128xf32> -> vector<8x128xf32>
    %10 = arith.index_cast %c0_i32_5 : i32 to index
    %c0_8 = arith.constant 0 : index
    %c0_9 = arith.constant 0 : index
    %11 = vector.load %arg2[%10, %c0_8, %c0_9] : memref<4x8x128xbf16, #tpu.memory_space<vmem>>, vector<1x8x128xbf16>
    %12 = vector.shape_cast %11 : vector<1x8x128xbf16> to vector<8x128xbf16>
    %13 = arith.extf %12 : vector<8x128xbf16> to vector<8x128xf32>
    %14 = arith.addf %9, %13 : vector<8x128xf32>
    %15 = math.tanh %14 : vector<8x128xf32>
    %16 = arith.index_cast %c0_i32_5 : i32 to index
    %c0_10 = arith.constant 0 : index
    %c0_11 = arith.constant 0 : index
    %17 = vector.load %arg4[%16, %c0_10, %c0_11] : memref<4x8x1xf32, #tpu.memory_space<vmem>>, vector<1x8x1xf32>
    %18 = vector.shape_cast %17 : vector<1x8x1xf32> to vector<8x1xf32>
    %cst_12 = arith.constant 5.000000e-01 : f32
    %19 = vector.broadcast %cst_12 : f32 to vector<8x1xf32>
    %20 = arith.cmpf ogt, %18, %19 : vector<8x1xf32>
    %21 = vector.shape_cast %20 : vector<8x1xi1> to vector<8x1xi1>
    %22 = vector.broadcast %21 : vector<8x1xi1> to vector<8x128xi1>
    %23 = arith.select %22, %15, %4 : vector<8x128xi1>, vector<8x128xf32>
    %24 = arith.truncf %23 : vector<8x128xf32> to vector<8x128xbf16>
    %25 = arith.index_cast %c0_i32_5 : i32 to index
    %c0_13 = arith.constant 0 : index
    %c0_14 = arith.constant 0 : index
    %26 = vector.load %arg10[%25, %c0_13, %c0_14] : memref<4x8x128xbf16, #tpu.memory_space<vmem>>, vector<1x8x128xbf16>
    %27 = vector.shape_cast %26 : vector<1x8x128xbf16> to vector<8x128xbf16>
    %28 = vector.shape_cast %24 : vector<8x128xbf16> to vector<1x8x128xbf16>
    tpu.vector_store %arg10[%25, %c0_13, %c0_14], %28 {strides = array<i32>} : memref<4x8x128xbf16, #tpu.memory_space<vmem>>, vector<1x8x128xbf16>,
    %c3_i32 = arith.constant 3 : i32
    %29 = arith.subi %c3_i32, %c0_i32_5 : i32
    %30 = arith.truncf %6 : vector<8x128xf32> to vector<8x128xbf16>
    %c0_15 = arith.constant 0 : index
    %c0_16 = arith.constant 0 : index
    %31 = vector.load %arg9[%c0_15, %c0_16] : memref<128x128xbf16, #tpu.memory_space<vmem>>, vector<128x128xbf16>
    %cst_17 = arith.constant dense<0.000000e+00> : vector<8x128xf32>
    %32 = tpu.matmul %30, %31, %cst_17 {dimension_numbers = #tpu.dot_dimension_numbers<[1], [0], [0], [1], [0, 0, 1, 1], [], []>} : vector<8x128xbf16>, vector<128x128xbf16>, vector<8x128xf32> -> vector<8x128xf32>
    %33 = arith.index_cast %29 : i32 to index
    %c0_18 = arith.constant 0 : index
    %c0_19 = arith.constant 0 : index
    %34 = vector.load %arg3[%33, %c0_18, %c0_19] : memref<4x8x128xbf16, #tpu.memory_space<vmem>>, vector<1x8x128xbf16>
    %35 = vector.shape_cast %34 : vector<1x8x128xbf16> to vector<8x128xbf16>
    %36 = arith.extf %35 : vector<8x128xbf16> to vector<8x128xf32>
    %37 = arith.addf %32, %36 : vector<8x128xf32>
    %38 = math.tanh %37 : vector<8x128xf32>
    %39 = arith.index_cast %29 : i32 to index
    %c0_20 = arith.constant 0 : index
    %c0_21 = arith.constant 0 : index
    %40 = vector.load %arg5[%39, %c0_20, %c0_21] : memref<4x8x1xf32, #tpu.memory_space<vmem>>, vector<1x8x1xf32>
    %41 = vector.shape_cast %40 : vector<1x8x1xf32> to vector<8x1xf32>
    %cst_22 = arith.constant 5.000000e-01 : f32
    %42 = vector.broadcast %cst_22 : f32 to vector<8x1xf32>
    %43 = arith.cmpf ogt, %41, %42 : vector<8x1xf32>
    %44 = vector.shape_cast %43 : vector<8x1xi1> to vector<8x1xi1>
    %45 = vector.broadcast %44 : vector<8x1xi1> to vector<8x128xi1>
    %46 = arith.select %45, %38, %6 : vector<8x128xi1>, vector<8x128xf32>
    %47 = arith.truncf %46 : vector<8x128xf32> to vector<8x128xbf16>
    %48 = arith.index_cast %29 : i32 to index
    %c0_23 = arith.constant 0 : index
    %c0_24 = arith.constant 0 : index
    %49 = vector.load %arg11[%48, %c0_23, %c0_24] : memref<4x8x128xbf16, #tpu.memory_space<vmem>>, vector<1x8x128xbf16>
    %50 = vector.shape_cast %49 : vector<1x8x128xbf16> to vector<8x128xbf16>
    %51 = vector.shape_cast %47 : vector<8x128xbf16> to vector<1x8x128xbf16>
    tpu.vector_store %arg11[%48, %c0_23, %c0_24], %51 {strides = array<i32>} : memref<4x8x128xbf16, #tpu.memory_space<vmem>>, vector<1x8x128xbf16>,
    %c1_i32 = arith.constant 1 : i32
    %52 = arith.truncf %23 : vector<8x128xf32> to vector<8x128xbf16>
    %c0_25 = arith.constant 0 : index
    %c0_26 = arith.constant 0 : index
    %53 = vector.load %arg8[%c0_25, %c0_26] : memref<128x128xbf16, #tpu.memory_space<vmem>>, vector<128x128xbf16>
    %cst_27 = arith.constant dense<0.000000e+00> : vector<8x128xf32>
    %54 = tpu.matmul %52, %53, %cst_27 {dimension_numbers = #tpu.dot_dimension_numbers<[1], [0], [0], [1], [0, 0, 1, 1], [], []>} : vector<8x128xbf16>, vector<128x128xbf16>, vector<8x128xf32> -> vector<8x128xf32>
    %55 = arith.index_cast %c1_i32 : i32 to index
    %c0_28 = arith.constant 0 : index
    %c0_29 = arith.constant 0 : index
    %56 = vector.load %arg2[%55, %c0_28, %c0_29] : memref<4x8x128xbf16, #tpu.memory_space<vmem>>, vector<1x8x128xbf16>
    %57 = vector.shape_cast %56 : vector<1x8x128xbf16> to vector<8x128xbf16>
    %58 = arith.extf %57 : vector<8x128xbf16> to vector<8x128xf32>
    %59 = arith.addf %54, %58 : vector<8x128xf32>
    %60 = math.tanh %59 : vector<8x128xf32>
    %61 = arith.index_cast %c1_i32 : i32 to index
    %c0_30 = arith.constant 0 : index
    %c0_31 = arith.constant 0 : index
    %62 = vector.load %arg4[%61, %c0_30, %c0_31] : memref<4x8x1xf32, #tpu.memory_space<vmem>>, vector<1x8x1xf32>
    %63 = vector.shape_cast %62 : vector<1x8x1xf32> to vector<8x1xf32>
    %cst_32 = arith.constant 5.000000e-01 : f32
    %64 = vector.broadcast %cst_32 : f32 to vector<8x1xf32>
    %65 = arith.cmpf ogt, %63, %64 : vector<8x1xf32>
    %66 = vector.shape_cast %65 : vector<8x1xi1> to vector<8x1xi1>
    %67 = vector.broadcast %66 : vector<8x1xi1> to vector<8x128xi1>
    %68 = arith.select %67, %60, %23 : vector<8x128xi1>, vector<8x128xf32>
    %69 = arith.truncf %68 : vector<8x128xf32> to vector<8x128xbf16>
    %70 = arith.index_cast %c1_i32 : i32 to index
    %c0_33 = arith.constant 0 : index
    %c0_34 = arith.constant 0 : index
    %71 = vector.load %arg10[%70, %c0_33, %c0_34] : memref<4x8x128xbf16, #tpu.memory_space<vmem>>, vector<1x8x128xbf16>
    %72 = vector.shape_cast %71 : vector<1x8x128xbf16> to vector<8x128xbf16>
    %73 = vector.shape_cast %69 : vector<8x128xbf16> to vector<1x8x128xbf16>
    tpu.vector_store %arg10[%70, %c0_33, %c0_34], %73 {strides = array<i32>} : memref<4x8x128xbf16, #tpu.memory_space<vmem>>, vector<1x8x128xbf16>,
    %c3_i32_35 = arith.constant 3 : i32
    %74 = arith.subi %c3_i32_35, %c1_i32 : i32
    %75 = arith.truncf %46 : vector<8x128xf32> to vector<8x128xbf16>
    %c0_36 = arith.constant 0 : index
    %c0_37 = arith.constant 0 : index
    %76 = vector.load %arg9[%c0_36, %c0_37] : memref<128x128xbf16, #tpu.memory_space<vmem>>, vector<128x128xbf16>
    %cst_38 = arith.constant dense<0.000000e+00> : vector<8x128xf32>
    %77 = tpu.matmul %75, %76, %cst_38 {dimension_numbers = #tpu.dot_dimension_numbers<[1], [0], [0], [1], [0, 0, 1, 1], [], []>} : vector<8x128xbf16>, vector<128x128xbf16>, vector<8x128xf32> -> vector<8x128xf32>
    %78 = arith.index_cast %74 : i32 to index
    %c0_39 = arith.constant 0 : index
    %c0_40 = arith.constant 0 : index
    %79 = vector.load %arg3[%78, %c0_39, %c0_40] : memref<4x8x128xbf16, #tpu.memory_space<vmem>>, vector<1x8x128xbf16>
    %80 = vector.shape_cast %79 : vector<1x8x128xbf16> to vector<8x128xbf16>
    %81 = arith.extf %80 : vector<8x128xbf16> to vector<8x128xf32>
    %82 = arith.addf %77, %81 : vector<8x128xf32>
    %83 = math.tanh %82 : vector<8x128xf32>
    %84 = arith.index_cast %74 : i32 to index
    %c0_41 = arith.constant 0 : index
    %c0_42 = arith.constant 0 : index
    %85 = vector.load %arg5[%84, %c0_41, %c0_42] : memref<4x8x1xf32, #tpu.memory_space<vmem>>, vector<1x8x1xf32>
    %86 = vector.shape_cast %85 : vector<1x8x1xf32> to vector<8x1xf32>
    %cst_43 = arith.constant 5.000000e-01 : f32
    %87 = vector.broadcast %cst_43 : f32 to vector<8x1xf32>
    %88 = arith.cmpf ogt, %86, %87 : vector<8x1xf32>
    %89 = vector.shape_cast %88 : vector<8x1xi1> to vector<8x1xi1>
    %90 = vector.broadcast %89 : vector<8x1xi1> to vector<8x128xi1>
    %91 = arith.select %90, %83, %46 : vector<8x128xi1>, vector<8x128xf32>
    %92 = arith.truncf %91 : vector<8x128xf32> to vector<8x128xbf16>
    %93 = arith.index_cast %74 : i32 to index
    %c0_44 = arith.constant 0 : index
    %c0_45 = arith.constant 0 : index
    %94 = vector.load %arg11[%93, %c0_44, %c0_45] : memref<4x8x128xbf16, #tpu.memory_space<vmem>>, vector<1x8x128xbf16>
    %95 = vector.shape_cast %94 : vector<1x8x128xbf16> to vector<8x128xbf16>
    %96 = vector.shape_cast %92 : vector<8x128xbf16> to vector<1x8x128xbf16>
    tpu.vector_store %arg11[%93, %c0_44, %c0_45], %96 {strides = array<i32>} : memref<4x8x128xbf16, #tpu.memory_space<vmem>>, vector<1x8x128xbf16>,
    %c2_i32 = arith.constant 2 : i32
    %97 = arith.truncf %68 : vector<8x128xf32> to vector<8x128xbf16>
    %c0_46 = arith.constant 0 : index
    %c0_47 = arith.constant 0 : index
    %98 = vector.load %arg8[%c0_46, %c0_47] : memref<128x128xbf16, #tpu.memory_space<vmem>>, vector<128x128xbf16>
    %cst_48 = arith.constant dense<0.000000e+00> : vector<8x128xf32>
    %99 = tpu.matmul %97, %98, %cst_48 {dimension_numbers = #tpu.dot_dimension_numbers<[1], [0], [0], [1], [0, 0, 1, 1], [], []>} : vector<8x128xbf16>, vector<128x128xbf16>, vector<8x128xf32> -> vector<8x128xf32>
    %100 = arith.index_cast %c2_i32 : i32 to index
    %c0_49 = arith.constant 0 : index
    %c0_50 = arith.constant 0 : index
    %101 = vector.load %arg2[%100, %c0_49, %c0_50] : memref<4x8x128xbf16, #tpu.memory_space<vmem>>, vector<1x8x128xbf16>
    %102 = vector.shape_cast %101 : vector<1x8x128xbf16> to vector<8x128xbf16>
    %103 = arith.extf %102 : vector<8x128xbf16> to vector<8x128xf32>
    %104 = arith.addf %99, %103 : vector<8x128xf32>
    %105 = math.tanh %104 : vector<8x128xf32>
    %106 = arith.index_cast %c2_i32 : i32 to index
    %c0_51 = arith.constant 0 : index
    %c0_52 = arith.constant 0 : index
    %107 = vector.load %arg4[%106, %c0_51, %c0_52] : memref<4x8x1xf32, #tpu.memory_space<vmem>>, vector<1x8x1xf32>
    %108 = vector.shape_cast %107 : vector<1x8x1xf32> to vector<8x1xf32>
    %cst_53 = arith.constant 5.000000e-01 : f32
    %109 = vector.broadcast %cst_53 : f32 to vector<8x1xf32>
    %110 = arith.cmpf ogt, %108, %109 : vector<8x1xf32>
    %111 = vector.shape_cast %110 : vector<8x1xi1> to vector<8x1xi1>
    %112 = vector.broadcast %111 : vector<8x1xi1> to vector<8x128xi1>
    %113 = arith.select %112, %105, %68 : vector<8x128xi1>, vector<8x128xf32>
    %114 = arith.truncf %113 : vector<8x128xf32> to vector<8x128xbf16>
    %115 = arith.index_cast %c2_i32 : i32 to index
    %c0_54 = arith.constant 0 : index
    %c0_55 = arith.constant 0 : index
    %116 = vector.load %arg10[%115, %c0_54, %c0_55] : memref<4x8x128xbf16, #tpu.memory_space<vmem>>, vector<1x8x128xbf16>
    %117 = vector.shape_cast %116 : vector<1x8x128xbf16> to vector<8x128xbf16>
    %118 = vector.shape_cast %114 : vector<8x128xbf16> to vector<1x8x128xbf16>
    tpu.vector_store %arg10[%115, %c0_54, %c0_55], %118 {strides = array<i32>} : memref<4x8x128xbf16, #tpu.memory_space<vmem>>, vector<1x8x128xbf16>,
    %c3_i32_56 = arith.constant 3 : i32
    %119 = arith.subi %c3_i32_56, %c2_i32 : i32
    %120 = arith.truncf %91 : vector<8x128xf32> to vector<8x128xbf16>
    %c0_57 = arith.constant 0 : index
    %c0_58 = arith.constant 0 : index
    %121 = vector.load %arg9[%c0_57, %c0_58] : memref<128x128xbf16, #tpu.memory_space<vmem>>, vector<128x128xbf16>
    %cst_59 = arith.constant dense<0.000000e+00> : vector<8x128xf32>
    %122 = tpu.matmul %120, %121, %cst_59 {dimension_numbers = #tpu.dot_dimension_numbers<[1], [0], [0], [1], [0, 0, 1, 1], [], []>} : vector<8x128xbf16>, vector<128x128xbf16>, vector<8x128xf32> -> vector<8x128xf32>
    %123 = arith.index_cast %119 : i32 to index
    %c0_60 = arith.constant 0 : index
    %c0_61 = arith.constant 0 : index
    %124 = vector.load %arg3[%123, %c0_60, %c0_61] : memref<4x8x128xbf16, #tpu.memory_space<vmem>>, vector<1x8x128xbf16>
    %125 = vector.shape_cast %124 : vector<1x8x128xbf16> to vector<8x128xbf16>
    %126 = arith.extf %125 : vector<8x128xbf16> to vector<8x128xf32>
    %127 = arith.addf %122, %126 : vector<8x128xf32>
    %128 = math.tanh %127 : vector<8x128xf32>
    %129 = arith.index_cast %119 : i32 to index
    %c0_62 = arith.constant 0 : index
    %c0_63 = arith.constant 0 : index
    %130 = vector.load %arg5[%129, %c0_62, %c0_63] : memref<4x8x1xf32, #tpu.memory_space<vmem>>, vector<1x8x1xf32>
    %131 = vector.shape_cast %130 : vector<1x8x1xf32> to vector<8x1xf32>
    %cst_64 = arith.constant 5.000000e-01 : f32
    %132 = vector.broadcast %cst_64 : f32 to vector<8x1xf32>
    %133 = arith.cmpf ogt, %131, %132 : vector<8x1xf32>
    %134 = vector.shape_cast %133 : vector<8x1xi1> to vector<8x1xi1>
    %135 = vector.broadcast %134 : vector<8x1xi1> to vector<8x128xi1>
    %136 = arith.select %135, %128, %91 : vector<8x128xi1>, vector<8x128xf32>
    %137 = arith.truncf %136 : vector<8x128xf32> to vector<8x128xbf16>
    %138 = arith.index_cast %119 : i32 to index
    %c0_65 = arith.constant 0 : index
    %c0_66 = arith.constant 0 : index
    %139 = vector.load %arg11[%138, %c0_65, %c0_66] : memref<4x8x128xbf16, #tpu.memory_space<vmem>>, vector<1x8x128xbf16>
    %140 = vector.shape_cast %139 : vector<1x8x128xbf16> to vector<8x128xbf16>
    %141 = vector.shape_cast %137 : vector<8x128xbf16> to vector<1x8x128xbf16>
    tpu.vector_store %arg11[%138, %c0_65, %c0_66], %141 {strides = array<i32>} : memref<4x8x128xbf16, #tpu.memory_space<vmem>>, vector<1x8x128xbf16>,
    %c3_i32_67 = arith.constant 3 : i32
    %142 = arith.truncf %113 : vector<8x128xf32> to vector<8x128xbf16>
    %c0_68 = arith.constant 0 : index
    %c0_69 = arith.constant 0 : index
    %143 = vector.load %arg8[%c0_68, %c0_69] : memref<128x128xbf16, #tpu.memory_space<vmem>>, vector<128x128xbf16>
    %cst_70 = arith.constant dense<0.000000e+00> : vector<8x128xf32>
    %144 = tpu.matmul %142, %143, %cst_70 {dimension_numbers = #tpu.dot_dimension_numbers<[1], [0], [0], [1], [0, 0, 1, 1], [], []>} : vector<8x128xbf16>, vector<128x128xbf16>, vector<8x128xf32> -> vector<8x128xf32>
    %145 = arith.index_cast %c3_i32_67 : i32 to index
    %c0_71 = arith.constant 0 : index
    %c0_72 = arith.constant 0 : index
    %146 = vector.load %arg2[%145, %c0_71, %c0_72] : memref<4x8x128xbf16, #tpu.memory_space<vmem>>, vector<1x8x128xbf16>
    %147 = vector.shape_cast %146 : vector<1x8x128xbf16> to vector<8x128xbf16>
    %148 = arith.extf %147 : vector<8x128xbf16> to vector<8x128xf32>
    %149 = arith.addf %144, %148 : vector<8x128xf32>
    %150 = math.tanh %149 : vector<8x128xf32>
    %151 = arith.index_cast %c3_i32_67 : i32 to index
    %c0_73 = arith.constant 0 : index
    %c0_74 = arith.constant 0 : index
    %152 = vector.load %arg4[%151, %c0_73, %c0_74] : memref<4x8x1xf32, #tpu.memory_space<vmem>>, vector<1x8x1xf32>
    %153 = vector.shape_cast %152 : vector<1x8x1xf32> to vector<8x1xf32>
    %cst_75 = arith.constant 5.000000e-01 : f32
    %154 = vector.broadcast %cst_75 : f32 to vector<8x1xf32>
    %155 = arith.cmpf ogt, %153, %154 : vector<8x1xf32>
    %156 = vector.shape_cast %155 : vector<8x1xi1> to vector<8x1xi1>
    %157 = vector.broadcast %156 : vector<8x1xi1> to vector<8x128xi1>
    %158 = arith.select %157, %150, %113 : vector<8x128xi1>, vector<8x128xf32>
    %159 = arith.truncf %158 : vector<8x128xf32> to vector<8x128xbf16>
    %160 = arith.index_cast %c3_i32_67 : i32 to index
    %c0_76 = arith.constant 0 : index
    %c0_77 = arith.constant 0 : index
    %161 = vector.load %arg10[%160, %c0_76, %c0_77] : memref<4x8x128xbf16, #tpu.memory_space<vmem>>, vector<1x8x128xbf16>
    %162 = vector.shape_cast %161 : vector<1x8x128xbf16> to vector<8x128xbf16>
    %163 = vector.shape_cast %159 : vector<8x128xbf16> to vector<1x8x128xbf16>
    tpu.vector_store %arg10[%160, %c0_76, %c0_77], %163 {strides = array<i32>} : memref<4x8x128xbf16, #tpu.memory_space<vmem>>, vector<1x8x128xbf16>,
    %c3_i32_78 = arith.constant 3 : i32
    %164 = arith.subi %c3_i32_78, %c3_i32_67 : i32
    %165 = arith.truncf %136 : vector<8x128xf32> to vector<8x128xbf16>
    %c0_79 = arith.constant 0 : index
    %c0_80 = arith.constant 0 : index
    %166 = vector.load %arg9[%c0_79, %c0_80] : memref<128x128xbf16, #tpu.memory_space<vmem>>, vector<128x128xbf16>
    %cst_81 = arith.constant dense<0.000000e+00> : vector<8x128xf32>
    %167 = tpu.matmul %165, %166, %cst_81 {dimension_numbers = #tpu.dot_dimension_numbers<[1], [0], [0], [1], [0, 0, 1, 1], [], []>} : vector<8x128xbf16>, vector<128x128xbf16>, vector<8x128xf32> -> vector<8x128xf32>
    %168 = arith.index_cast %164 : i32 to index
    %c0_82 = arith.constant 0 : index
    %c0_83 = arith.constant 0 : index
    %169 = vector.load %arg3[%168, %c0_82, %c0_83] : memref<4x8x128xbf16, #tpu.memory_space<vmem>>, vector<1x8x128xbf16>
    %170 = vector.shape_cast %169 : vector<1x8x128xbf16> to vector<8x128xbf16>
    %171 = arith.extf %170 : vector<8x128xbf16> to vector<8x128xf32>
    %172 = arith.addf %167, %171 : vector<8x128xf32>
    %173 = math.tanh %172 : vector<8x128xf32>
    %174 = arith.index_cast %164 : i32 to index
    %c0_84 = arith.constant 0 : index
    %c0_85 = arith.constant 0 : index
    %175 = vector.load %arg5[%174, %c0_84, %c0_85] : memref<4x8x1xf32, #tpu.memory_space<vmem>>, vector<1x8x1xf32>
    %176 = vector.shape_cast %175 : vector<1x8x1xf32> to vector<8x1xf32>
    %cst_86 = arith.constant 5.000000e-01 : f32
    %177 = vector.broadcast %cst_86 : f32 to vector<8x1xf32>
    %178 = arith.cmpf ogt, %176, %177 : vector<8x1xf32>
    %179 = vector.shape_cast %178 : vector<8x1xi1> to vector<8x1xi1>
    %180 = vector.broadcast %179 : vector<8x1xi1> to vector<8x128xi1>
    %181 = arith.select %180, %173, %136 : vector<8x128xi1>, vector<8x128xf32>
    %182 = arith.truncf %181 : vector<8x128xf32> to vector<8x128xbf16>
    %183 = arith.index_cast %164 : i32 to index
    %c0_87 = arith.constant 0 : index
    %c0_88 = arith.constant 0 : index
    %184 = vector.load %arg11[%183, %c0_87, %c0_88] : memref<4x8x128xbf16, #tpu.memory_space<vmem>>, vector<1x8x128xbf16>
    %185 = vector.shape_cast %184 : vector<1x8x128xbf16> to vector<8x128xbf16>
    %186 = vector.shape_cast %182 : vector<8x128xbf16> to vector<1x8x128xbf16>
    tpu.vector_store %arg11[%183, %c0_87, %c0_88], %186 {strides = array<i32>} : memref<4x8x128xbf16, #tpu.memory_space<vmem>>, vector<1x8x128xbf16>,
    %c4_i32 = arith.constant 4 : i32
    %c0_89 = arith.constant 0 : index
    %c0_90 = arith.constant 0 : index
    %c0_91 = arith.constant 0 : index
    %187 = vector.load %arg12[%c0_89, %c0_90, %c0_91] : memref<2x8x128xf32, #tpu.memory_space<vmem>>, vector<1x8x128xf32>
    %188 = vector.shape_cast %187 : vector<1x8x128xf32> to vector<8x128xf32>
    %189 = vector.shape_cast %158 : vector<8x128xf32> to vector<1x8x128xf32>
    tpu.vector_store %arg12[%c0_89, %c0_90, %c0_91], %189 {strides = array<i32>} : memref<2x8x128xf32, #tpu.memory_space<vmem>>, vector<1x8x128xf32>,
    %c1_92 = arith.constant 1 : index
    %c0_93 = arith.constant 0 : index
    %c0_94 = arith.constant 0 : index
    %190 = vector.load %arg12[%c1_92, %c0_93, %c0_94] : memref<2x8x128xf32, #tpu.memory_space<vmem>>, vector<1x8x128xf32>
    %191 = vector.shape_cast %190 : vector<1x8x128xf32> to vector<8x128xf32>
    %192 = vector.shape_cast %181 : vector<8x128xf32> to vector<1x8x128xf32>
    tpu.vector_store %arg12[%c1_92, %c0_93, %c0_94], %192 {strides = array<i32>} : memref<2x8x128xf32, #tpu.memory_space<vmem>>, vector<1x8x128xf32>,
    return
  }
  func.func @transform_0(%arg0: i32, %arg1: i32) -> (i32, i32, i32) {
    %c0_i32 = arith.constant 0 : i32
    %c0_i32_0 = arith.constant 0 : i32
    return %arg1, %arg0, %c0_i32 : i32, i32, i32
  }
  func.func @transform_1(%arg0: i32, %arg1: i32) -> (i32, i32, i32) {
    %c2_i32 = arith.constant 2 : i32
    %0 = arith.subi %c2_i32, %arg1 : i32
    %c0_i32 = arith.constant 0 : i32
    %c0_i32_0 = arith.constant 0 : i32
    return %0, %arg0, %c0_i32 : i32, i32, i32
  }
  func.func @transform_2(%arg0: i32, %arg1: i32) -> (i32, i32, i32) {
    %c0_i32 = arith.constant 0 : i32
    %c0_i32_0 = arith.constant 0 : i32
    return %arg1, %arg0, %c0_i32 : i32, i32, i32
  }
  func.func @transform_3(%arg0: i32, %arg1: i32) -> (i32, i32, i32) {
    %c2_i32 = arith.constant 2 : i32
    %0 = arith.subi %c2_i32, %arg1 : i32
    %c0_i32 = arith.constant 0 : i32
    %c0_i32_0 = arith.constant 0 : i32
    return %0, %arg0, %c0_i32 : i32, i32, i32
  }
  func.func @transform_4(%arg0: i32, %arg1: i32) -> (i32, i32) {
    %c0_i32 = arith.constant 0 : i32
    %c0_i32_0 = arith.constant 0 : i32
    return %arg0, %c0_i32 : i32, i32
  }
  func.func @transform_5(%arg0: i32, %arg1: i32) -> (i32, i32) {
    %c0_i32 = arith.constant 0 : i32
    %c0_i32_0 = arith.constant 0 : i32
    return %arg0, %c0_i32 : i32, i32
  }
  func.func @transform_6(%arg0: i32, %arg1: i32) -> (i32, i32) {
    %c0_i32 = arith.constant 0 : i32
    %c0_i32_0 = arith.constant 0 : i32
    %c0_i32_1 = arith.constant 0 : i32
    return %c0_i32, %c0_i32_0 : i32, i32
  }
  func.func @transform_7(%arg0: i32, %arg1: i32) -> (i32, i32) {
    %c0_i32 = arith.constant 0 : i32
    %c0_i32_0 = arith.constant 0 : i32
    %c0_i32_1 = arith.constant 0 : i32
    return %c0_i32, %c0_i32_0 : i32, i32
  }
  func.func @transform_8(%arg0: i32, %arg1: i32) -> (i32, i32, i32) {
    %c0_i32 = arith.constant 0 : i32
    %c0_i32_0 = arith.constant 0 : i32
    return %arg1, %arg0, %c0_i32 : i32, i32, i32
  }
  func.func @transform_9(%arg0: i32, %arg1: i32) -> (i32, i32, i32) {
    %c2_i32 = arith.constant 2 : i32
    %0 = arith.subi %c2_i32, %arg1 : i32
    %c0_i32 = arith.constant 0 : i32
    %c0_i32_0 = arith.constant 0 : i32
    return %0, %arg0, %c0_i32 : i32, i32, i32
  }
}

</mosaic_0001>

<bundles_post_ra>
// kernel: tpu_custom_call.1
= control target key start
LH: loop header
LB: loop body
LE: loop exit
PB: predicated region body
PF: predicated region fallthrough
CT: control target
= control target key end

     0   :  { %s3134_s0 = inlined_call_operand.vmem [shape: bf16[12,8,128], index: 0, kind: input, shape index: {}]   ;;  %s3135_s1 = inlined_call_operand.hbm [shape: bf16[12,8,128], index: 1, kind: input, shape index: {}]   ;;  %s3136_s2 = inlined_call_operand.vmem [shape: f32[12,8,1], index: 2, kind: input, shape index: {}]   ;;  %s3137_s3 = inlined_call_operand.vmem [shape: f32[12,8,1], index: 3, kind: input, shape index: {}]   ;;  %s3138_s4 = inlined_call_operand.vmem [shape: f32[8,128], index: 4, kind: input, shape index: {}]   ;;  %s3139_s5 = inlined_call_operand.vmem [shape: f32[8,128], index: 5, kind: input, shape index: {}]   ;;  %s3140_s6 = inlined_call_operand.vmem [shape: bf16[128,128], index: 6, kind: input, shape index: {}]   ;;  %s3141_s7 = inlined_call_operand.vmem [shape: bf16[128,128], index: 7, kind: input, shape index: {}]   ;;  %s3142_s8 = inlined_call_operand.hbm [shape: bf16[12,8,128], index: 8, kind: output, shape index: {0}]   ;;  %s3143_s9 = inlined_call_operand.hbm [shape: bf16[12,8,128], index: 9, kind: output, shape index: {1}]  }
   0x1   :  { %3160 = sst [smem:[#allocation24_spill]] %s3135_s1 }
   0x2   :  { %3161 = sst [smem:[#allocation25_spill]] %s3143_s9 }
   0x3   :  { %15 = vsyncpa [#allocation4], 0 }
   0x4   :  { %17 = vsyncpa [#allocation4 + $0x1], 0 }
   0x5   :  { %18 = vsyncpa [#allocation5], 0 }
   0x6   :  { %20 = vsyncpa [#allocation5 + $0x1], 0 }
   0x7   :  { %21 = vsyncpa [#allocation8], 0 }
   0x8   :  { %23 = vsyncpa [#allocation8 + $0x1], 0  ;;  %s2489_s30 = smov 0   ;;  %s2491_s10 = smov 0  }
   0x9   :  { %s2493_s11 = smov 0   ;;  %s2495_s12 = smov 0  }
   0xa   :  { %s2497_s13 = smov 0   ;;  %s2499_s14 = smov 0  }
   0xb   :  { %s2501_s15 = smov 0   ;;  %s2503_s16 = smov 0  }
   0xc   :  { %s2505_s17 = smov 0  }
   0xd LB: > { %3162 = sst [smem:[#allocation12_spill]] %s2395_s30  ;;  %s1734_s18 = sadd.s32 4294967295, %s2427_s17   ;;  %s2427_s17 = sphi %s2505_s17, %s29_s17   ;;  %s2423_s16 = sphi %s2503_s16, %s3201_s16   ;;  %s2419_s15 = sphi %s2501_s15, %s3205_s15   ;;  %s2415_s14 = sphi %s2499_s14, %s3199_s14   ;;  %s2411_s13 = sphi %s2497_s13, %s3198_s13   ;;  %s2407_s12 = sphi %s2495_s12, %s3197_s12   ;;  %s2403_s11 = sphi %s2493_s11, %s3204_s11   ;;  %s2399_s10 = sphi %s2491_s10, %s3203_s10   ;;  %s2395_s30 = sphi %s2489_s30, %s3202_s30  }
   0xe   : > { %3163 = sst [smem:[#allocation13_spill]] %s2403_s11  ;;  %s1735_s19 = sadd.s32 4294967294, %s2427_s17  }
   0xf   : > { %3164 = sst [smem:[#allocation14_spill]] %s2407_s12  ;;  %s38_s20 = sadd.s32 1, %s2423_s16 }
  0x10   : > { %3165 = sst [smem:[#allocation15_spill]] %s2411_s13  ;;  %s73_s21 = ssub.s32 2, %s2423_s16 }
  0x11   : > { %3166 = sst [smem:[#allocation16_spill]] %s2415_s14  ;;  %p39_p0 = scmp.ge.s32.totalorder %s38_s20, 3 }
  0x12   : > { %3167 = sst [smem:[#allocation17_spill]] %s2423_s16  ;;  %s80_s22 = sadd.s32 1, %s2415_s14 }
  0x13   : > { %3168 = sst [smem:[#allocation18_spill]] %s2427_s17  ;;  %p87_p1 = scmp.ne.s32.totalorder %s2415_s14, %s2411_s13 }
  0x14   : > { %p88_p2 = scmp.eq.s32.totalorder %s2427_s17, 0  ;;  %s3207_s20 = smov (%p39_p0, %s38_s20), 0 }
  0x15   : > { %3169 = sst [smem:[#allocation19_spill]] %s3207_s20  ;;  %p93_p4 = scmp.ne.s32.totalorder %s2411_s13, %s2407_s12 }
  0x16   : > { %p2547_p3 = por %p88_p2, %p87_p1  ;;  %s74_s24 = ssub.s32 2, %s3207_s20 }
  0x17   : > { %p94_p5 = scmp.eq.s32.totalorder %s1734_s18, 0  ;;  %s75_s25 = ssub.s32 %s73_s21, %s74_s24 }
  0x18   : > { %s255_s26 = ssub.s32 %s2423_s16, %s3207_s20  ;;  %p78_p6 = scmp.eq.s32.totalorder %s75_s25, 0 }
  0x19   : > { %p2559_p7 = por %p94_p5, %p93_p4  ;;  %p258_p8 = scmp.eq.s32.totalorder %s255_s26, 0 }
  0x1a   : > { %s260_s28 = sadd.s32 1, %s2403_s11  ;;  %p270_p9 = scmp.ne.s32.totalorder %s2403_s11, %s2399_s10 }
  0x1b   : > { %s2565_s29 = scalar_select %p78_p6, %s2415_s14, %s80_s22  }
  0x1c   : > { %s2568_s9 = scalar_select %p258_p8, %s2403_s11, %s260_s28  }
  0x1d   : > { %3172 = sst [smem:[#allocation20_spill]] %s2565_s29  ;;  %p271_p10 = scmp.eq.s32.totalorder %s1734_s18, 2 }
  0x1e   : > { %3173 = sst [smem:[#allocation21_spill]] %s2568_s9  ;;  %p276_p11 = scmp.ne.s32.totalorder %s2399_s10, %s2395_s30 }
  0x1f   : > { %p277_p12 = scmp.eq.s32.totalorder %s1735_s19, 2  ;;  %p2574_p13 = por %p271_p10, %p270_p9 }
  0x20   : > { %p2581_p0 = por %p271_p10, %p87_p1  ;;  %p2096_p6 = scmp.lt.s32.totalorder %s2427_s17, 3 }
  0x21   : > { %s3174_s24 = scalar_select %p2574_p13, 1, 0 }
  0x22   : > { %s3175_s25 = scalar_select %p2581_p0, 1, 0 }
  0x23   : > { %p2585_p2 = por %p277_p12, %p276_p11  ;;  %p2592_p5 = por %p277_p12, %p93_p4 }
  0x24   : > { %s359_s18 = sand.u32 1, %s2415_s14   ;;  %s1844_s19 = sshll.u32 %s73_s21, 8 }
  0x25   : > { %s3176_s26 = scalar_select %p2585_p2, 1, 0 }
  0x26   : > { %s3178_s22 = scalar_select %p2592_p5, 1, 0 }
  0x27   : > { %3177 = sst [smem:[#allocation22_spill]] %s3176_s26  ;;  %s1740_s28 = sshll.u32 %s359_s18, 4 }
  0x28   : > { %3179 = sst [smem:[#allocation23_spill]] %s3178_s22  ;;  %s3180_s1 = sld [smem:[#allocation24_spill]] }
  0x29   : > { %s363_s9 = scalar_lea.vmem [#allocation3], %s1740_s28  ;;  %p2605_p1 = pnand %p2096_p6, %p2547_p3 }
  0x2a   : > { %s372_s11 = sshll.u32 %s363_s9, 4  ;;  %s2611_s21 = scalar_lea.sflag [#allocation4], %s359_s18  ;;  %s2609_s11 = int_to_ptr.vmem [resolvable:$true] %s372_s11 }
  0x2b   : > { %p2261_p8 = pneg %p2605_p1 }
  0x2e   : > { %s2601_s29 = scalar_lea.hbm %s3180_s1, %s1844_s19  ;;  %s2264_s23 = scalar_lea.hbm %s3180_s1, 768 }
  0x2f   : > { %s2259_s16 = scalar_lea.hbm %s2601_s29, 256  ;;  %p2265_p3 = scmp.lt.u32.totalorder %s2601_s29, %s3180_s1 }
  0x30   : > { %p2260_p4 = scmp.ne.s32.totalorder %s2601_s29, %s2259_s16  ;;  %p2266_p11 = scmp.lt.u32.totalorder %s2264_s23, %s2259_s16 }
  0x31   : > { %p2268_p6 = scmp.lt.u32.totalorder %s2259_s16, %s2601_s29 }
  0x32   : > { %p2262_p9 = pnand %p2261_p8, %p2260_p4  ;;  %p2267_p12 = por %p2266_p11, %p2265_p3 }
  0x34   : > { %p2263_p10 = pneg %p2262_p9  ;;  %p2269_p5 = por %p2268_p6, %p2267_p12 }
  0x36   : > { %p2270_p2 = pnand %p2269_p5, %p2263_p10 }
  0x38   : > { %2273 = shalt.err (!%p2270_p2)
}
  0x39   : > { %s2274_s18 = scalar_lea.vmem %s2609_s11, 256  ;;  %s2429_s9 = smov [#allocation3]  }
  0x3a   : > { %p2275_p4 = scmp.ne.s32.totalorder %s2609_s11, %s2274_s18  ;;  %s2279_s20 = sshll.u32 %s2429_s9, 4  ;;  %s2280_s20 = int_to_ptr.vmem [resolvable:$false] %s2279_s20 }
  0x3b   : > { %s2281_s19 = scalar_lea.vmem %s2280_s20, 512  ;;  %p2282_p13 = scmp.lt.s32.totalorder %s2609_s11, %s2280_s20 }
  0x3c   : > { %p2277_p9 = pnand %p2275_p4, %p2261_p8  ;;  %p2283_p3 = scmp.lt.s32.totalorder %s2281_s19, %s2274_s18 }
  0x3e   : > { %p2278_p0 = pneg %p2277_p9  ;;  %p2284_p11 = por %p2283_p3, %p2282_p13 }
  0x40   : > { %p2285_p12 = pnand %p2284_p11, %p2278_p0 }
  0x42   : > { %2288 = shalt.err (!%p2285_p12)
}
  0x43   : > { %s2430_s16 = smov 64   ;;  %s2431_s23 = smov 4  }
  0x44   : > { %2088 = dma.hbm_to_vmem [thread:$0]  (!%p2605_p1), %s2601_s29, 256, %s2609_s11, %s2611_s21, %s2430_s16, %s2430_s16, %s2431_s23  }
  0x45   : > { %p1743_p2 = scmp.ge.s32.totalorder %s2427_s17, 1  ;;  %p406_p5 = scmp.lt.s32.totalorder %s2427_s17, 4 }
  0x47   : > { %p407_p8 = pnand %p1743_p2, %p406_p5 }
  0x48   : > { %s2642_s28 = sand.u32 (!%p407_p8), 1, %s2411_s13  }
  0x49   : > { %410 = sbr.rel (%p407_p8) target bundleno = 1079 (0x437), region = 52  ;;  %s1744_s18 = sshll.u32 (!%p407_p8), %s2642_s28, 4 }
  0x4a   : > { %s413_s9 = scalar_lea.sflag (!%p407_p8), [#allocation4], %s2642_s28  ;;  %s2646_s20 = scalar_lea.vmem (!%p407_p8), [#allocation3], %s1744_s18 }
  0x50   : > { %2382 = dma.done.wait (%p2559_p7), %s413_s9, 256  }
  0x51   : > { %2384 = vsyncadd (%p2559_p7), %s413_s9, 4294967040  ;;  %s3154_s11 = sand.u32 1, %s2399_s10   ;;  %s1747_s29 = sshll.u32 %s2419_s15, 2 }
  0x52   : > { %s1745_s12 = sshll.u32 %s3154_s11, 4  ;;  %p490_p13 = scmp.lt.s32.totalorder %s1747_s29, 11 }
  0x53   : > { %s3159_s21 = ssub.s32 2, %s2419_s15  ;;  %p1753_p0 = scmp.ne.s32.totalorder %s2419_s15, 0 }
  0x54   : > { %s3209_s29 = smov (!%p490_p13, %s1747_s29), 11  ;;  %s1751_s19 = sshll.u32 %s3159_s21, 2  ;;  %v536_v0 = vld [vmem:[%s3138_s4] sm:$0xff] (!%p1753_p0) }
  0x55   : > { %s1748_s16 = sshll.u32 %s3209_s29, 2  ;;  %s1750_s23 = sshll.u32 %s3209_s29, 3  ;;  %v538_v1 = vld [vmem:[%s3139_s5] sm:$0xff] (!%p1753_p0)  ;;  %537 = vst [vmem:[#allocation2] sm:$0xff] (!%p1753_p0), %v536_v0 }
  0x56   : > { %s2662_s27 = scalar_lea.vmem %s3134_s0, %s1748_s16  ;;  %s2667_s22 = scalar_lea.vmem %s3136_s2, %s1750_s23  ;;  %540 = vst [vmem:[#allocation2 + $0x8] sm:$0xff] (!%p1753_p0), %v538_v1 }
  0x57   : > { %p511_p7 = scmp.lt.s32.totalorder %s1751_s19, 11  ;;  %s2674_s21 = scalar_lea.vmem [#allocation6], %s1745_s12 }
  0x58   : > { %s2676_s29 = scalar_lea.vmem [#allocation7], %s1744_s18  ;;  %535 = sbr.rel (%p1753_p0) target bundleno = 95 (0x5f), region = 60 }
  0x59   : > { %s3211_s19 = smov (!%p511_p7, %s1751_s19), 11 }
  0x5a   : > { %s1752_s11 = sshll.u32 %s3211_s19, 3 }
  0x5b   : > { %s2672_s17 = scalar_lea.vmem %s3137_s3, %s1752_s11 }
  0x5f PF: > { %v2179_v2 = vld [vmem:[%s3140_s6] sm:$0xff]   ;;  %v2432_v3 = vmov 0.0   ;;  %v2181_v5 = vld [vmem:[%s3140_s6 + $0x8] sm:$0xff]   ;;  %vm2433_vm0 = vmmov 0   ;;  %v2434_v7 = vmov 0   ;;  %v2183_v8 = vld [vmem:[%s3140_s6 + $0x10] sm:$0xff]  }
  0x60   : > { %1919 = vmatprep.subr.bf16.mxu0 %v2432_v3  ;;  %1939 = vmatprep.subr.bf16.mxu1 %v2432_v3  ;;  %v2180_v4 = vld [vmem:[%s3141_s7] sm:$0xff]   ;;  %v2182_v6 = vld [vmem:[%s3141_s7 + $0x8] sm:$0xff]   ;;  %v2184_v9 = vld [vmem:[%s3141_s7 + $0x10] sm:$0xff]   ;;  %s3182_s26 = ssub.s32 2, %s2419_s15  ;;  %s1540_s11 = sshll.u32 %s2676_s29, 4  ;;  %s3040_s11 = int_to_ptr.vmem [resolvable:$true] %s1540_s11 }
  0x61   : > { %1920 = vmatpush3.bf16.msra.mxu0 %v2179_v2  ;;  %1935 = vmatprep.mubr.msk.bf16.mxu0 %vm2433_vm0, %v2432_v3  ;;  %v2185_v10 = vld [vmem:[%s3140_s6 + $0x18] sm:$0xff]   ;;  %v2187_v12 = vld [vmem:[%s3140_s6 + $0x20] sm:$0xff]   ;;  %v2189_v16 = vld [vmem:[%s3140_s6 + $0x28] sm:$0xff]   ;;  %s1846_s18 = sshll.u32 %s3182_s26, 8  ;;  %s3183_s12 = sld [smem:[#allocation25_spill]] }
  0x62   : > { %1940 = vmatpush3.bf16.msra.mxu1 %v2180_v4  ;;  %1921 = vmatprep.subr.bf16.mxu0 %v2432_v3  ;;  %v2186_v11 = vld [vmem:[%s3141_s7 + $0x18] sm:$0xff]   ;;  %v2188_v13 = vld [vmem:[%s3141_s7 + $0x20] sm:$0xff]   ;;  %v2190_v18 = vld [vmem:[%s3141_s7 + $0x28] sm:$0xff]   ;;  %s3185_s23 = sand.u32 1, %s2399_s10   ;;  %p3186_p10 = scmp.ne.s32.totalorder %s3174_s24, 0 }
  0x63   : > { %1941 = vmatprep.subr.bf16.mxu1 %v2432_v3  ;;  %1955 = vmatprep.mubr.msk.bf16.mxu1 %vm2433_vm0, %v2432_v3  ;;  %v652_v14 = vld [vmem:[%s2667_s22] sm:$0xff]  ;;  %v1771_v15 = vld [vmem:[%s2672_s17 + $0x18] sm:$0xff]  ;;  %v1804_v19 = vld [vmem:[%s2667_s22 + $0x10] sm:$0xff]  ;;  %s3045_s9 = scalar_lea.sflag [#allocation5], %s3185_s23  ;;  %s2435_s14 = smov [#allocation6]  }
  0x64   : > { %2177 = vset.pattern.permute.xlu0 %v2434_v7  ;;  %2178 = vset.pattern.permute.xlu1 %v2434_v7  ;;  %vm653_vm1 = vcmp.gt.f32.partialorder %v652_v14, 0.5  ;;  %vm773_vm2 = vcmp.gt.f32.partialorder %v1771_v15, 0.5  ;;  %v1826_v21 = vld [vmem:[%s2667_s22 + $0x18] sm:$0xff]  ;;  %v2191_v22 = vld [vmem:[%s3140_s6 + $0x30] sm:$0xff]   ;;  %vm1133_vm3 = vcmp.gt.f32.partialorder %v1804_v19, 0.5  ;;  %v2760_v27 = vld [vmem:[#allocation2] sm:$0xff] }
  0x65   : > { %1922 = vmatpush3.bf16.msra.mxu0 %v2181_v5  ;;  %v654_v17 = vsel %vm653_vm1, 1, %v2434_v7  ;;  %v774_v20 = vsel %vm773_vm2, 1, %v2434_v7  ;;  %v2192_v23 = vld [vmem:[%s3141_s7 + $0x30] sm:$0xff]   ;;  %v2193_v24 = vld [vmem:[%s3140_s6 + $0x38] sm:$0xff]   ;;  %vm1373_vm4 = vcmp.gt.f32.partialorder %v1826_v21, 0.5  ;;  %v1134_v26 = vsel %vm1133_vm3, 1, %v2434_v7 }
  0x66   : > { %1942 = vmatpush3.bf16.msra.mxu1 %v2182_v6  ;;  %1923 = vmatprep.subr.bf16.mxu0 %v2432_v3  ;;  %v2194_v25 = vld [vmem:[%s3141_s7 + $0x38] sm:$0xff]   ;;  %v2763_v28 = vld [vmem:[#allocation2 + $0x8] sm:$0xff]  ;;  %v1374_v29 = vsel %vm1373_vm4, 1, %v2434_v7  ;;  %v2195_v30 = vld [vmem:[%s3140_s6] sm:$0xff]   ;;  %v544_v31 = vpack.c.bf16 %v2760_v27, %v2760_v27 }
  0x67   : > { %1943 = vmatprep.subr.bf16.mxu1 %v2432_v3  ;;  %656 = vperm.xlu0 %2177, %v654_v17   ;;  %v2196_v32 = vld [vmem:[%s3141_s7] sm:$0xff]   ;;  %v662_v33 = vpack.c.bf16 %v2763_v28, %v2763_v28  ;;  %v2197_v34 = vld [vmem:[%s3140_s6 + $0x8] sm:$0xff]   ;;  %v2199_v36 = vld [vmem:[%s3140_s6 + $0x10] sm:$0xff]   ;;  %s3184_s19 = smov %s3183_s12 }
  0x68   : > { %v2198_v35 = vld [vmem:[%s3141_s7 + $0x8] sm:$0xff]   ;;  %v2200_v37 = vld [vmem:[%s3141_s7 + $0x10] sm:$0xff]   ;;  %v2201_v38 = vld [vmem:[%s3140_s6 + $0x18] sm:$0xff]  }
  0x69   : > { %1924 = vmatpush3.bf16.msra.mxu0 %v2183_v8  ;;  %v2202_v39 = vld [vmem:[%s3141_s7 + $0x18] sm:$0xff]   ;;  %v2203_v40 = vld [vmem:[%s3140_s6 + $0x20] sm:$0xff]   ;;  %v2205_v42 = vld [vmem:[%s3140_s6 + $0x28] sm:$0xff]  }
  0x6a   : > { %1944 = vmatpush3.bf16.msra.mxu1 %v2184_v9  ;;  %1925 = vmatprep.subr.bf16.mxu0 %v2432_v3  ;;  %v2204_v41 = vld [vmem:[%s3141_s7 + $0x20] sm:$0xff]   ;;  %v2206_v43 = vld [vmem:[%s3141_s7 + $0x28] sm:$0xff]   ;;  %v2207_v44 = vld [vmem:[%s3140_s6 + $0x30] sm:$0xff]  }
  0x6b   : > { %1945 = vmatprep.subr.bf16.mxu1 %v2432_v3  ;;  %776 = vperm.xlu0 %2177, %v774_v20   ;;  %v2208_v45 = vld [vmem:[%s3141_s7 + $0x30] sm:$0xff]   ;;  %v2209_v46 = vld [vmem:[%s3140_s6 + $0x38] sm:$0xff]   ;;  %v1782_v48 = vld [vmem:[%s2667_s22 + $0x8] sm:$0xff] }
  0x6c   : > { %v2210_v47 = vld [vmem:[%s3141_s7 + $0x38] sm:$0xff]   ;;  %v1793_v49 = vld [vmem:[%s2672_s17 + $0x10] sm:$0xff]  ;;  %vm893_vm5 = vcmp.gt.f32.partialorder %v1782_v48, 0.5  ;;  %v1815_v51 = vld [vmem:[%s2672_s17 + $0x8] sm:$0xff] }
  0x6d   : > { %1926 = vmatpush3.bf16.msra.mxu0 %v2185_v10  ;;  %vm1013_vm6 = vcmp.gt.f32.partialorder %v1793_v49, 0.5  ;;  %v894_v50 = vsel %vm893_vm5, 1, %v2434_v7  ;;  %vm1253_vm7 = vcmp.gt.f32.partialorder %v1815_v51, 0.5  ;;  %v1490_v53 = vld [vmem:[%s2672_s17] sm:$0xff]  ;;  %v2853_v57 = vld [vmem:[%s2646_s20 + $0x8] sm:$0xff]   ;;  %v2215_v19 = vld [vmem:[%s3140_s6 + $0x10] sm:$0xff]  }
  0x6e   : > { %1946 = vmatpush3.bf16.msra.mxu1 %v2186_v11  ;;  %1927 = vmatprep.subr.bf16.mxu0 %v2432_v3  ;;  %v1014_v52 = vsel %vm1013_vm6, 1, %v2434_v7  ;;  %v1254_v54 = vsel %vm1253_vm7, 1, %v2434_v7  ;;  %vm1491_vm8 = vcmp.gt.f32.partialorder %v1490_v53, 0.5  ;;  %v2850_v56 = vld [vmem:[%s2662_s27] sm:$0xff]   ;;  %v681_v59 = vunpack.c.h.bf16 %v2853_v57  ;;  %v2213_v17 = vld [vmem:[%s3140_s6 + $0x8] sm:$0xff]   ;;  %v2216_v20 = vld [vmem:[%s3141_s7 + $0x10] sm:$0xff]  }
  0x6f   : > { %1947 = vmatprep.subr.bf16.mxu1 %v2432_v3  ;;  %1136 = vperm.xlu0 %2177, %v1134_v26   ;;  %v1492_v55 = vsel %vm1491_vm8, 1, %v2434_v7  ;;  %v562_v58 = vunpack.c.l.bf16 %v2850_v56  ;;  %v2212_v15 = vld [vmem:[%s3141_s7] sm:$0xff]   ;;  %v2217_v21 = vld [vmem:[%s3140_s6 + $0x18] sm:$0xff]   ;;  %v2222_v26 = vld [vmem:[%s3141_s7 + $0x28] sm:$0xff]  }
  0x70   : > { %896 = vperm.xlu1 %2178, %v894_v50   ;;  %v2227_v48 = vld [vmem:[%s3140_s6] sm:$0xff]   ;;  %v2229_v53 = vld [vmem:[%s3140_s6 + $0x8] sm:$0xff]  }
  0x71   : > { %1928 = vmatpush3.bf16.msra.mxu0 %v2187_v12  ;;  %v2211_v12 = vld [vmem:[%s3140_s6] sm:$0xff]  }
  0x72   : > { %1948 = vmatpush3.bf16.msra.mxu1 %v2188_v13  ;;  %1929 = vmatprep.subr.bf16.mxu0 %v2432_v3  ;;  %v2228_v51 = vld [vmem:[%s3141_s7] sm:$0xff]  }
  0x73   : > { %1949 = vmatprep.subr.bf16.mxu1 %v2432_v3  ;;  %1376 = vperm.xlu0 %2177, %v1374_v29   ;;  %v2225_v29 = vld [vmem:[%s3140_s6 + $0x38] sm:$0xff]  }
  0x74   : > { %1016 = vperm.xlu1 %2178, %v1014_v52  }
  0x75   : > { %1930 = vmatpush3.bf16.msra.mxu0 %v2189_v16 }
  0x76   : > { %1950 = vmatpush3.bf16.msra.mxu1 %v2190_v18  ;;  %1931 = vmatprep.subr.bf16.mxu0 %v2432_v3  ;;  %v2214_v18 = vld [vmem:[%s3141_s7 + $0x8] sm:$0xff]  }
  0x77   : > { %1951 = vmatprep.subr.bf16.mxu1 %v2432_v3 }
  0x78   : > { %1256 = vperm.xlu1 %2178, %v1254_v54   ;;  %v2230_v54 = vld [vmem:[%s3141_s7 + $0x8] sm:$0xff]  }
  0x79   : > { %1932 = vmatpush3.bf16.msra.mxu0 %v2191_v22  ;;  %v2218_v22 = vld [vmem:[%s3141_s7 + $0x18] sm:$0xff]  }
  0x7a   : > { %1952 = vmatpush3.bf16.msra.mxu1 %v2192_v23  ;;  %1933 = vmatprep.subr.bf16.mxu0 %v2432_v3  ;;  %v2219_v23 = vld [vmem:[%s3140_s6 + $0x20] sm:$0xff]  }
  0x7b   : > { %1953 = vmatprep.subr.bf16.mxu1 %v2432_v3 }
  0x7c   : > { %1494 = vperm.xlu1 %2178, %v1492_v55   ;;  %v2231_v55 = vld [vmem:[%s3140_s6 + $0x10] sm:$0xff]  }
  0x7d   : > { %1934 = vmatpush3.bf16.msra.mxu0 %v2193_v24  ;;  %v2220_v24 = vld [vmem:[%s3141_s7 + $0x20] sm:$0xff]  }
  0x7e   : > { %1954 = vmatpush3.bf16.msra.mxu1 %v2194_v25  ;;  %1959 = vmatprep.subr.bf16.mxu0 %v2432_v3  ;;  %v2221_v25 = vld [vmem:[%s3140_s6 + $0x28] sm:$0xff]  }
  0x7f   : > { %1979 = vmatprep.subr.bf16.mxu1 %v2432_v3 }
  0x80   : > { %1936 = vmatmul.mubr.bf16.vlgmr.msra.gmra.mrb[0].mxu0 %v544_v31  ;;  %v801_v31 = vunpack.c.h.bf16 %v2850_v56  ;;  %v2232_v56 = vld [vmem:[%s3141_s7 + $0x10] sm:$0xff]  }
  0x81   : > { %1956 = vmatmul.mubr.bf16.vlgmr.msra.gmra.mrb[0].mxu1 %v662_v33  ;;  %1960 = vmatpush3.bf16.msra.mxu0 %v2195_v30  ;;  %v2226_v30 = vld [vmem:[%s3141_s7 + $0x38] sm:$0xff]  }
  0x82   : > { %1980 = vmatpush3.bf16.msra.mxu1 %v2196_v32  ;;  %1961 = vmatprep.subr.bf16.mxu0 %v2432_v3  ;;  %v921_v32 = vunpack.c.l.bf16 %v2853_v57  ;;  %v2233_v57 = vld [vmem:[%s3140_s6 + $0x18] sm:$0xff]  }
  0x83   : > { %1981 = vmatprep.subr.bf16.mxu1 %v2432_v3  ;;  %1975 = vmatprep.mubr.msk.bf16.mxu0 %vm2433_vm0, %v2432_v3 }
  0x84   : > { %1995 = vmatprep.mubr.msk.bf16.mxu1 %vm2433_vm0, %v2432_v3 }
  0x85   : > { %1962 = vmatpush3.bf16.msra.mxu0 %v2197_v34 }
  0x86   : > { %1982 = vmatpush3.bf16.msra.mxu1 %v2198_v35  ;;  %1963 = vmatprep.subr.bf16.mxu0 %v2432_v3 }
  0x87   : > { %1983 = vmatprep.subr.bf16.mxu1 %v2432_v3 }
  0x89   : > { %1964 = vmatpush3.bf16.msra.mxu0 %v2199_v36 }
  0x8a   : > { %1984 = vmatpush3.bf16.msra.mxu1 %v2200_v37  ;;  %1965 = vmatprep.subr.bf16.mxu0 %v2432_v3 }
  0x8b   : > { %1985 = vmatprep.subr.bf16.mxu1 %v2432_v3 }
  0x8d   : > { %1966 = vmatpush3.bf16.msra.mxu0 %v2201_v38 }
  0x8e   : > { %1986 = vmatpush3.bf16.msra.mxu1 %v2202_v39  ;;  %1967 = vmatprep.subr.bf16.mxu0 %v2432_v3 }
  0x8f   : > { %1987 = vmatprep.subr.bf16.mxu1 %v2432_v3 }
  0x91   : > { %1968 = vmatpush3.bf16.msra.mxu0 %v2203_v40 }
  0x92   : > { %1988 = vmatpush3.bf16.msra.mxu1 %v2204_v41  ;;  %1969 = vmatprep.subr.bf16.mxu0 %v2432_v3 }
  0x93   : > { %1989 = vmatprep.subr.bf16.mxu1 %v2432_v3 }
  0x95   : > { %1970 = vmatpush3.bf16.msra.mxu0 %v2205_v42 }
  0x96   : > { %1990 = vmatpush3.bf16.msra.mxu1 %v2206_v43  ;;  %1971 = vmatprep.subr.bf16.mxu0 %v2432_v3 }
  0x97   : > { %1991 = vmatprep.subr.bf16.mxu1 %v2432_v3 }
  0x99   : > { %1972 = vmatpush3.bf16.msra.mxu0 %v2207_v44 }
  0x9a   : > { %1992 = vmatpush3.bf16.msra.mxu1 %v2208_v45  ;;  %1973 = vmatprep.subr.bf16.mxu0 %v2432_v3 }
  0x9b   : > { %1993 = vmatprep.subr.bf16.mxu1 %v2432_v3 }
  0x9d   : > { %1974 = vmatpush3.bf16.msra.mxu0 %v2209_v46 }
  0x9e   : > { %1994 = vmatpush3.bf16.msra.mxu1 %v2210_v47  ;;  %1999 = vmatprep.subr.bf16.mxu0 %v2432_v3 }
  0x9f   : > { %2019 = vmatprep.subr.bf16.mxu1 %v2432_v3 }
  0xe6   : > { %v657_v7 = vpop.permute.xlu0 %656 }
  0xe7   : > { %vm658_vm9 = vcmp.eq.s32.totalorder %v657_v7, 1 }
  0xea   : > { %v777_v9 = vpop.permute.xlu0 %776 }
  0xeb   : > { %vm778_vm10 = vcmp.eq.s32.totalorder %v777_v9, 1 }
  0xef   : > { %v897_v43 = vpop.permute.xlu1 %896 }
  0xf0   : > { %vm898_vm11 = vcmp.eq.s32.totalorder %v897_v43, 1 }
  0xf3   : > { %v1017_v45 = vpop.permute.xlu1 %1016 }
  0xf4   : > { %vm1018_vm12 = vcmp.eq.s32.totalorder %v1017_v45, 1 }
 0x153   : > { %v645_v60 = vpop.f32.mrb[0].mxu0 }
 0x154   : > { %v646_v61 = vadd.f32 %v645_v60, %v562_v58  ;;  %v764_v62 = vpop.f32.mrb[0].mxu1  ;;  %v1937_v63 = vpop.f32.mrb[1].mxu0  ;;  %v2234_v58 = vld [vmem:[%s3141_s7 + $0x18] sm:$0xff]   ;;  %v2236_v60 = vld [vmem:[%s3141_s7 + $0x20] sm:$0xff]  }
 0x155   : > { %v765_v0 = vadd.f32 %v764_v62, %v681_v59  ;;  %v1957_v1 = vpop.f32.mrb[1].mxu1  ;;  %v648_v2 = vpop.f32.mrb[2].mxu0  ;;  %v2235_v59 = vld [vmem:[%s3140_s6 + $0x20] sm:$0xff]   ;;  %v2238_v62 = vld [vmem:[%s3141_s7 + $0x28] sm:$0xff]   ;;  %v2239_v63 = vld [vmem:[%s3140_s6 + $0x30] sm:$0xff]  }
 0x156   : > { %2243 = vtanh.f32 %v646_v61  ;;  %v767_v4 = vpop.f32.mrb[2].mxu1  ;;  %v1938_v5 = vpop.f32.mrb[3].mxu0  ;;  %v2237_v61 = vld [vmem:[%s3140_s6 + $0x28] sm:$0xff]   ;;  %v2241_v1 = vld [vmem:[%s3140_s6 + $0x38] sm:$0xff]  }
 0x157   : > { %2245 = vtanh.f32 %v765_v0  ;;  %v1958_v6 = vpop.f32.mrb[3].mxu1  ;;  %v2240_v0 = vld [vmem:[%s3141_s7 + $0x30] sm:$0xff]   ;;  %v2242_v2 = vld [vmem:[%s3141_s7 + $0x38] sm:$0xff]   ;;  %v1795_v4 = vld [vmem:[%s2662_s27 + $0x8] sm:$0xff]   ;;  %s1522_s27 = sshll.u32 %s2674_s21, 4  ;;  %s3033_s27 = int_to_ptr.vmem [resolvable:$true] %s1522_s27 }
 0x158   : > { %v1806_v5 = vld [vmem:[%s2646_s20] sm:$0xff]   ;;  %v1041_v6 = vunpack.c.l.bf16 %v1795_v4  ;;  %s1845_s20 = sshll.u32 %s2419_s15, 8  ;;  %s3038_s15 = scalar_lea.hbm %s3183_s12, %s1846_s18 }
 0x159   : > { %v1161_v7 = vunpack.c.h.bf16 %v1806_v5  ;;  %s3028_s30 = scalar_lea.hbm %s3142_s8, %s1845_s20  ;;  %s2289_s1 = scalar_lea.vmem %s3033_s27, 256 }
 0x15a   : > { %p2290_p1 = scmp.ne.s32.totalorder %s3033_s27, %s2289_s1  ;;  %s2293_s20 = sshll.u32 %s2435_s14, 4  ;;  %s2294_s20 = int_to_ptr.vmem [resolvable:$false] %s2293_s20 }
 0x15b   : > { %s2295_s13 = scalar_lea.vmem %s2294_s20, 512  ;;  %p2296_p9 = scmp.lt.s32.totalorder %s3033_s27, %s2294_s20 }
 0x15c   : > { %p2291_p6 = pnand %p2290_p1, %p3186_p10  ;;  %p2297_p3 = scmp.lt.s32.totalorder %s2295_s13, %s2289_s1 }
 0x15e   : > { %p2292_p4 = pneg %p2291_p6  ;;  %p2298_p11 = por %p2297_p3, %p2296_p9 }
 0x160   : > { %v2244_v8 = vpop.eup %2243  ;;  %p2299_p12 = pnand %p2298_p11, %p2292_p4 }
 0x161   : > { %v2246_v10 = vpop.eup %2245  ;;  %v2858_v11 = vsel %vm658_vm9, %v2244_v8, %v2760_v27  ;;  %v2223_v27 = vld [vmem:[%s3140_s6 + $0x30] sm:$0xff]  }
 0x162   : > { %v660_v13 = vpack.c.bf16 %v2858_v11, %v2858_v11  ;;  %v2866_v14 = vsel %vm778_vm10, %v2246_v10, %v2763_v28  ;;  %v2224_v28 = vld [vmem:[%s3141_s7 + $0x30] sm:$0xff]  }
 0x163   : > { %v780_v16 = vpack.c.bf16 %v2866_v14, %v2866_v14 }
 0x164   : > { %661 = vst [vmem:[%s2674_s21] sm:$0xf] %v660_v13  ;;  %1976 = vmatmul.mubr.bf16.vlgmr.msra.gmra.mrb[4].mxu0 %v660_v13 }
 0x165   : > { %1772 = vst [vmem:[%s2676_s29 + $0xc] sm:$0xf] %v780_v16  ;;  %1996 = vmatmul.mubr.bf16.vlgmr.msra.gmra.mrb[4].mxu1 %v780_v16  ;;  %2000 = vmatpush3.bf16.msra.mxu0 %v2211_v12 }
 0x166   : > { %2020 = vmatpush3.bf16.msra.mxu1 %v2212_v15  ;;  %2001 = vmatprep.subr.bf16.mxu0 %v2432_v3 }
 0x167   : > { %2021 = vmatprep.subr.bf16.mxu1 %v2432_v3  ;;  %2015 = vmatprep.mubr.msk.bf16.mxu0 %vm2433_vm0, %v2432_v3 }
 0x168   : > { %2035 = vmatprep.mubr.msk.bf16.mxu1 %vm2433_vm0, %v2432_v3 }
 0x169   : > { %2002 = vmatpush3.bf16.msra.mxu0 %v2213_v17  ;;  %v1137_v17 = vpop.permute.xlu0 %1136 }
 0x16a   : > { %2022 = vmatpush3.bf16.msra.mxu1 %v2214_v18  ;;  %2003 = vmatprep.subr.bf16.mxu0 %v2432_v3  ;;  %vm1138_vm13 = vcmp.eq.s32.totalorder %v1137_v17, 1 }
 0x16b   : > { %2023 = vmatprep.subr.bf16.mxu1 %v2432_v3 }
 0x16d   : > { %2004 = vmatpush3.bf16.msra.mxu0 %v2215_v19  ;;  %v1257_v19 = vpop.permute.xlu1 %1256 }
 0x16e   : > { %2024 = vmatpush3.bf16.msra.mxu1 %v2216_v20  ;;  %2005 = vmatprep.subr.bf16.mxu0 %v2432_v3  ;;  %vm1258_vm14 = vcmp.eq.s32.totalorder %v1257_v19, 1 }
 0x16f   : > { %2025 = vmatprep.subr.bf16.mxu1 %v2432_v3 }
 0x171   : > { %2006 = vmatpush3.bf16.msra.mxu0 %v2217_v21 }
 0x172   : > { %2026 = vmatpush3.bf16.msra.mxu1 %v2218_v22  ;;  %2007 = vmatprep.subr.bf16.mxu0 %v2432_v3 }
 0x173   : > { %2027 = vmatprep.subr.bf16.mxu1 %v2432_v3 }
 0x175   : > { %2008 = vmatpush3.bf16.msra.mxu0 %v2219_v23 }
 0x176   : > { %2028 = vmatpush3.bf16.msra.mxu1 %v2220_v24  ;;  %2009 = vmatprep.subr.bf16.mxu0 %v2432_v3 }
 0x177   : > { %2029 = vmatprep.subr.bf16.mxu1 %v2432_v3 }
 0x179   : > { %2010 = vmatpush3.bf16.msra.mxu0 %v2221_v25  ;;  %v1281_v25 = vunpack.c.h.bf16 %v1795_v4 }
 0x17a   : > { %2030 = vmatpush3.bf16.msra.mxu1 %v2222_v26  ;;  %2011 = vmatprep.subr.bf16.mxu0 %v2432_v3  ;;  %v1400_v26 = vunpack.c.l.bf16 %v1806_v5 }
 0x17b   : > { %2031 = vmatprep.subr.bf16.mxu1 %v2432_v3 }
 0x17d   : > { %2012 = vmatpush3.bf16.msra.mxu0 %v2223_v27 }
 0x17e   : > { %2032 = vmatpush3.bf16.msra.mxu1 %v2224_v28  ;;  %2013 = vmatprep.subr.bf16.mxu0 %v2432_v3 }
 0x17f   : > { %2033 = vmatprep.subr.bf16.mxu1 %v2432_v3 }
 0x181   : > { %2014 = vmatpush3.bf16.msra.mxu0 %v2225_v29 }
 0x182   : > { %2034 = vmatpush3.bf16.msra.mxu1 %v2226_v30  ;;  %2039 = vmatprep.subr.bf16.mxu0 %v2432_v3 }
 0x183   : > { %2059 = vmatprep.subr.bf16.mxu1 %v2432_v3 }
 0x237   : > { %v884_v33 = vpop.f32.mrb[4].mxu0 }
 0x238   : > { %v885_v34 = vadd.f32 %v884_v33, %v801_v31  ;;  %v1004_v35 = vpop.f32.mrb[4].mxu1  ;;  %v1977_v36 = vpop.f32.mrb[5].mxu0 }
 0x239   : > { %v1005_v37 = vadd.f32 %v1004_v35, %v921_v32  ;;  %v1997_v38 = vpop.f32.mrb[5].mxu1  ;;  %v887_v39 = vpop.f32.mrb[6].mxu0 }
 0x23a   : > { %2247 = vtanh.f32 %v885_v34  ;;  %v1007_v40 = vpop.f32.mrb[6].mxu1  ;;  %v1978_v41 = vpop.f32.mrb[7].mxu0 }
 0x23b   : > { %2249 = vtanh.f32 %v1005_v37  ;;  %v1998_v42 = vpop.f32.mrb[7].mxu1  ;;  %v1377_v37 = vpop.permute.xlu0 %1376 }
 0x23c   : > { %v1495_v38 = vpop.permute.xlu1 %1494  ;;  %vm1378_vm15 = vcmp.eq.s32.totalorder %v1377_v37, 1 }
 0x244   : > { %v2248_v44 = vpop.eup %2247 }
 0x245   : > { %v2250_v46 = vpop.eup %2249  ;;  %v2940_v47 = vsel %vm898_vm11, %v2248_v44, %v2858_v11 }
 0x246   : > { %v900_v49 = vpack.c.bf16 %v2940_v47, %v2940_v47  ;;  %v2948_v50 = vsel %vm1018_vm12, %v2250_v46, %v2866_v14 }
 0x247   : > { %v1020_v52 = vpack.c.bf16 %v2948_v50, %v2948_v50 }
 0x248   : > { %1783 = vst [vmem:[%s2674_s21 + $0x4] sm:$0xf] %v900_v49  ;;  %2016 = vmatmul.mubr.bf16.vlgmr.msra.gmra.mrb[8].mxu0 %v900_v49 }
 0x249   : > { %1794 = vst [vmem:[%s2676_s29 + $0x8] sm:$0xf] %v1020_v52  ;;  %2036 = vmatmul.mubr.bf16.vlgmr.msra.gmra.mrb[8].mxu1 %v1020_v52  ;;  %2040 = vmatpush3.bf16.msra.mxu0 %v2227_v48 }
 0x24a   : > { %2060 = vmatpush3.bf16.msra.mxu1 %v2228_v51  ;;  %2041 = vmatprep.subr.bf16.mxu0 %v2432_v3 }
 0x24b   : > { %2061 = vmatprep.subr.bf16.mxu1 %v2432_v3  ;;  %2055 = vmatprep.mubr.msk.bf16.mxu0 %vm2433_vm0, %v2432_v3 }
 0x24c   : > { %2075 = vmatprep.mubr.msk.bf16.mxu1 %vm2433_vm0, %v2432_v3  ;;  %vm1496_vm0 = vcmp.eq.s32.totalorder %v1495_v38, 1 }
 0x24d   : > { %2042 = vmatpush3.bf16.msra.mxu0 %v2229_v53 }
 0x24e   : > { %2062 = vmatpush3.bf16.msra.mxu1 %v2230_v54  ;;  %2043 = vmatprep.subr.bf16.mxu0 %v2432_v3 }
 0x24f   : > { %2063 = vmatprep.subr.bf16.mxu1 %v2432_v3 }
 0x251   : > { %2044 = vmatpush3.bf16.msra.mxu0 %v2231_v55 }
 0x252   : > { %2064 = vmatpush3.bf16.msra.mxu1 %v2232_v56  ;;  %2045 = vmatprep.subr.bf16.mxu0 %v2432_v3 }
 0x253   : > { %2065 = vmatprep.subr.bf16.mxu1 %v2432_v3 }
 0x255   : > { %2046 = vmatpush3.bf16.msra.mxu0 %v2233_v57 }
 0x256   : > { %2066 = vmatpush3.bf16.msra.mxu1 %v2234_v58  ;;  %2047 = vmatprep.subr.bf16.mxu0 %v2432_v3 }
 0x257   : > { %2067 = vmatprep.subr.bf16.mxu1 %v2432_v3 }
 0x259   : > { %2048 = vmatpush3.bf16.msra.mxu0 %v2235_v59 }
 0x25a   : > { %2068 = vmatpush3.bf16.msra.mxu1 %v2236_v60  ;;  %2049 = vmatprep.subr.bf16.mxu0 %v2432_v3 }
 0x25b   : > { %2069 = vmatprep.subr.bf16.mxu1 %v2432_v3 }
 0x25d   : > { %2050 = vmatpush3.bf16.msra.mxu0 %v2237_v61 }
 0x25e   : > { %2070 = vmatpush3.bf16.msra.mxu1 %v2238_v62  ;;  %2051 = vmatprep.subr.bf16.mxu0 %v2432_v3 }
 0x25f   : > { %2071 = vmatprep.subr.bf16.mxu1 %v2432_v3 }
 0x261   : > { %2052 = vmatpush3.bf16.msra.mxu0 %v2239_v63 }
 0x262   : > { %2072 = vmatpush3.bf16.msra.mxu1 %v2240_v0  ;;  %2053 = vmatprep.subr.bf16.mxu0 %v2432_v3 }
 0x263   : > { %2073 = vmatprep.subr.bf16.mxu1 %v2432_v3 }
 0x265   : > { %2054 = vmatpush3.bf16.msra.mxu0 %v2241_v1 }
 0x266   : > { %2074 = vmatpush3.bf16.msra.mxu1 %v2242_v2 }
 0x31b   : > { %v1124_v8 = vpop.f32.mrb[8].mxu0 }
 0x31c   : > { %v1125_v9 = vadd.f32 %v1124_v8, %v1041_v6  ;;  %v1244_v10 = vpop.f32.mrb[8].mxu1  ;;  %v2017_v11 = vpop.f32.mrb[9].mxu0 }
 0x31d   : > { %v1245_v12 = vadd.f32 %v1244_v10, %v1161_v7  ;;  %v2037_v13 = vpop.f32.mrb[9].mxu1  ;;  %v1127_v14 = vpop.f32.mrb[10].mxu0 }
 0x31e   : > { %2251 = vtanh.f32 %v1125_v9  ;;  %v1247_v15 = vpop.f32.mrb[10].mxu1  ;;  %v2018_v16 = vpop.f32.mrb[11].mxu0 }
 0x31f   : > { %2253 = vtanh.f32 %v1245_v12  ;;  %v2038_v3 = vpop.f32.mrb[11].mxu1 }
 0x328   : > { %v2252_v18 = vpop.eup %2251 }
 0x329   : > { %v2254_v20 = vpop.eup %2253  ;;  %v1139_v21 = vsel %vm1138_vm13, %v2252_v18, %v2940_v47 }
 0x32a   : > { %v1140_v22 = vpack.c.bf16 %v1139_v21, %v1139_v21  ;;  %v1259_v23 = vsel %vm1258_vm14, %v2254_v20, %v2948_v50 }
 0x32b   : > { %v1260_v24 = vpack.c.bf16 %v1259_v23, %v1259_v23 }
 0x32c   : > { %1805 = vst [vmem:[%s2674_s21 + $0x8] sm:$0xf] %v1140_v22  ;;  %2056 = vmatmul.mubr.bf16.vlgmr.msra.gmra.mrb[12].mxu0 %v1140_v22 }
 0x32d   : > { %1816 = vst [vmem:[%s2676_s29 + $0x4] sm:$0xf] %v1260_v24  ;;  %2076 = vmatmul.mubr.bf16.vlgmr.msra.gmra.mrb[12].mxu1 %v1260_v24 }
 0x3ff   : > { %v1364_v27 = vpop.f32.mrb[12].mxu0 }
 0x400   : > { %v1365_v28 = vadd.f32 %v1364_v27, %v1281_v25  ;;  %v1483_v29 = vpop.f32.mrb[12].mxu1  ;;  %v2057_v30 = vpop.f32.mrb[13].mxu0 }
 0x401   : > { %v1484_v31 = vadd.f32 %v1483_v29, %v1400_v26  ;;  %v2077_v32 = vpop.f32.mrb[13].mxu1  ;;  %v1367_v33 = vpop.f32.mrb[14].mxu0 }
 0x402   : > { %2255 = vtanh.f32 %v1365_v28  ;;  %v1486_v34 = vpop.f32.mrb[14].mxu1  ;;  %v2058_v35 = vpop.f32.mrb[15].mxu0 }
 0x403   : > { %2257 = vtanh.f32 %v1484_v31  ;;  %v2078_v36 = vpop.f32.mrb[15].mxu1 }
 0x40c   : > { %v2256_v39 = vpop.eup %2255 }
 0x40d   : > { %v2258_v40 = vpop.eup %2257  ;;  %v1379_v41 = vsel %vm1378_vm15, %v2256_v39, %v1139_v21 }
 0x40e   : > { %v1380_v42 = vpack.c.bf16 %v1379_v41, %v1379_v41  ;;  %1500 = vst [vmem:[#allocation2] sm:$0xff] %v1379_v41  ;;  %v1497_v43 = vsel %vm1496_vm0, %v2258_v40, %v1259_v23 }
 0x40f   : > { %v1498_v44 = vpack.c.bf16 %v1497_v43, %v1497_v43  ;;  %1501 = vst [vmem:[#allocation2 + $0x8] sm:$0xff] %v1497_v43 }
 0x410   : > { %1827 = vst [vmem:[%s2674_s21 + $0xc] sm:$0xf] %v1380_v42 }
 0x411   : > { %2302 = shalt.err (!%p2299_p12)
}
 0x412   : > { %s2303_s21 = scalar_lea.hbm %s3028_s30, 256  ;;  %s2307_s18 = scalar_lea.hbm %s3142_s8, 768 }
 0x413   : > { %p2304_p2 = scmp.ne.s32.totalorder %s3028_s30, %s2303_s21  ;;  %p2308_p13 = scmp.lt.u32.totalorder %s3028_s30, %s3142_s8 }
 0x414   : > { %p2309_p7 = scmp.lt.u32.totalorder %s2307_s18, %s2303_s21  ;;  %p2311_p1 = scmp.lt.u32.totalorder %s2303_s21, %s3028_s30 }
 0x415   : > { %p2305_p5 = pnand %p2304_p2, %p3186_p10 }
 0x416   : > { %p2310_p0 = por %p2309_p7, %p2308_p13 }
 0x417   : > { %p2306_p8 = pneg %p2305_p5 }
 0x418   : > { %p2312_p6 = por %p2311_p1, %p2310_p0 }
 0x41a   : > { %p2313_p4 = pnand %p2312_p6, %p2306_p8 }
 0x41c   : > { %2316 = shalt.err (!%p2313_p4)
}
 0x41d   : > { %s2436_s12 = smov 64   ;;  %s2437_s23 = smov 4   ;;  %1499 = vst [vmem:[%s2676_s29] sm:$0xf] %v1498_v44 }
 0x41e   : > { %2081 = dma.vmem_to_hbm [thread:$0]  (%p3186_p10), %s3033_s27, 256, %s3028_s30, %s3045_s9, %s2436_s12, %s2436_s12, %s2437_s23  }
 0x41f   : > { %s1508_s1 = scalar_lea.sflag [#allocation8], %s2642_s28  ;;  %s2317_s14 = scalar_lea.vmem %s3040_s11, 256 }
 0x420   : > { %p2318_p9 = scmp.ne.s32.totalorder %s3040_s11, %s2317_s14  ;;  %p3187_p3 = scmp.ne.s32.totalorder %s3175_s25, 0 }
 0x421   : > { %s2438_s20 = smov [#allocation7]  }
 0x422   : > { %p2319_p11 = pnand %p2318_p9, %p3187_p3  ;;  %s2321_s13 = sshll.u32 %s2438_s20, 4  ;;  %s2322_s13 = int_to_ptr.vmem [resolvable:$false] %s2321_s13 }
 0x423   : > { %s2323_s21 = scalar_lea.vmem %s2322_s13, 512  ;;  %p2324_p2 = scmp.lt.s32.totalorder %s3040_s11, %s2322_s13 }
 0x424   : > { %p2320_p12 = pneg %p2319_p11  ;;  %p2325_p5 = scmp.lt.s32.totalorder %s2323_s21, %s2317_s14 }
 0x426   : > { %p2326_p8 = por %p2325_p5, %p2324_p2 }
 0x428   : > { %p2327_p13 = pnand %p2326_p8, %p2320_p12 }
 0x42a   : > { %2330 = shalt.err (!%p2327_p13)
}
 0x42b   : > { %s2331_s24 = scalar_lea.hbm %s3038_s15, 256  ;;  %s2335_s30 = scalar_lea.hbm %s3184_s19, 768 }
 0x42c   : > { %p2332_p10 = scmp.ne.s32.totalorder %s3038_s15, %s2331_s24  ;;  %p2336_p1 = scmp.lt.u32.totalorder %s3038_s15, %s3184_s19 }
 0x42d   : > { %p2337_p6 = scmp.lt.u32.totalorder %s2335_s30, %s2331_s24  ;;  %p2339_p9 = scmp.lt.u32.totalorder %s2331_s24, %s3038_s15 }
 0x42e   : > { %p2333_p7 = pnand %p2332_p10, %p3187_p3 }
 0x42f   : > { %p2338_p4 = por %p2337_p6, %p2336_p1 }
 0x430   : > { %p2334_p0 = pneg %p2333_p7 }
 0x431   : > { %p2340_p11 = por %p2339_p9, %p2338_p4 }
 0x433   : > { %p2341_p12 = pnand %p2340_p11, %p2334_p0 }
 0x435   : > { %2344 = shalt.err (!%p2341_p12)
}
 0x436   : > { %2082 = dma.vmem_to_hbm [thread:$0]  (%p3187_p3), %s3040_s11, 256, %s3038_s15, %s1508_s1, %s2436_s12, %s2436_s12, %s2437_s23  }
 0x437 PF: > { %s3188_s26 = sld [smem:[#allocation18_spill]]  ;;  %s3189_s18 = sld [smem:[#allocation12_spill]] }
 0x438   : > { %s3190_s17 = sld [smem:[#allocation22_spill]] }
 0x43d   : > { %p2097_p2 = scmp.ge.s32.totalorder %s3188_s26, 2  ;;  %s1555_s22 = sand.u32 1, %s3189_s18  }
 0x43e   : > { %p3191_p5 = scmp.ne.s32.totalorder %s3190_s17, 0  ;;  %s1556_s14 = scalar_lea.sflag [#allocation5], %s1555_s22 }
 0x440   : > { %p2090_p8 = pnand %p2097_p2, %p3191_p5 }
 0x442   : > { %2386 = dma.done.wait (!%p2090_p8), %s1556_s14, 256  }
 0x443   : > { %2388 = vsyncadd (!%p2090_p8), %s1556_s14, 4294967040  ;;  %s3192_s25 = sld [smem:[#allocation14_spill]]  ;;  %s3193_s20 = sld [smem:[#allocation23_spill]] }
 0x449   : > { %s1564_s13 = sand.u32 1, %s3192_s25   ;;  %p3194_p13 = scmp.ne.s32.totalorder %s3193_s20, 0 }
 0x44a   : > { %s1565_s28 = scalar_lea.sflag [#allocation8], %s1564_s13 }
 0x44b   : > { %p2093_p10 = pnand %p2097_p2, %p3194_p13 }
 0x44d   : > { %2390 = dma.done.wait (!%p2093_p10), %s1565_s28, 256  }
 0x44e   : > { %2392 = vsyncadd (!%p2093_p10), %s1565_s28, 4294967040  ;;  %s29_s17 = sadd.s32 1, %s3188_s26   ;;  %s3195_s11 = sld [smem:[#allocation13_spill]] }
 0x44f   : > { %p26_p3 = scmp.ge.s32.totalorder %s29_s17, 5   ;;  %s3196_s15 = sld [smem:[#allocation21_spill]] }
 0x450   : > { %s3197_s12 = sld [smem:[#allocation15_spill]]  ;;  %s3198_s13 = sld [smem:[#allocation16_spill]] }
 0x451   : > { %s3199_s14 = sld [smem:[#allocation20_spill]]  ;;  %s3200_s23 = sld [smem:[#allocation17_spill]] }
 0x452   : > { %s3201_s16 = sld [smem:[#allocation19_spill]]  ;;  %s3202_s30 = smov %s2399_s10 }
 0x453   :  { %28 = sbr.rel (!%p26_p3) target bundleno = 13 (0xd), region = 153 }
 0x454   : > { %s3203_s10 = smov %s3195_s11 }
 0x455   : > { %s3204_s11 = smov %s3196_s15 }
 0x457   : > { %s3205_s15 = smov %s3200_s23 }
 0x45a   :  { %1570 = vsyncpa [#allocation4], 1 }
 0x45b   :  { %1572 = vsyncpa [#allocation4 + $0x1], 1 }
 0x45c   :  { %1573 = vsyncpa [#allocation5], 1 }
 0x45d   :  { %1575 = vsyncpa [#allocation5 + $0x1], 1 }
 0x45e   :  { %1576 = vsyncpa [#allocation8], 1 }
 0x45f   :  { %1578 = vsyncpa [#allocation8 + $0x1], 1 }

</bundles_post_ra>
